<compile_context>
chip_gen: v6e
topology: v6e:2x2x1
jax: 0.10.0
libtpu: 0.0.40
codegen_flags: <defaults>
</compile_context>

<pallas_src>
import jax
import jax.numpy as jnp
from jax.experimental import pallas as pl
from jax.experimental.pallas import tpu as pltpu


def _attn_kernel(x1_ref, x2t_ref, x3_ref, o_ref):
    # Full-array blocks: x1 (B,M,K), x2t (B,K,N), x3 (B,M,N), o (B,M,N)
    a = x1_ref[...]                       # (B, M, K)
    bt = x2t_ref[...]                     # (B, K, N)  pre-transposed rhs
    c = x3_ref[...].astype(jnp.float32)   # (B, M, N)  single hoisted cast

    inv_k = 1.0 / float(a.shape[-1])      # K is a power of 2 -> exact

    # v1 = x1 @ x2^T  (rhs already presented as (K, N): no XLU transpose)
    s = jnp.einsum("bmk,bkn->bmn", a, bt,
                   preferred_element_type=jnp.float32)

    # v2 = v1 / K ; v3 = v2 + x3
    s = s * inv_k + c

    # v4 = softmax(v3, -1) — numerically stable; normalization is folded
    # after the second matmul so the divide becomes one EUP reciprocal.
    m = jnp.max(s, axis=-1, keepdims=True)
    e = jnp.exp(s - m)
    denom = jnp.sum(e, axis=-1, keepdims=True)

    # v5 = v4 @ x3 == (e @ x3) * (1/denom)  (row-wise normalization commutes)
    num = jnp.einsum("bmn,bnp->bmp", e, c,
                     preferred_element_type=jnp.float32)
    o_ref[...] = (num * pl.reciprocal(denom, approx=True)).astype(o_ref.dtype)


def model_forward(x1, x2, x3):
    B, M, K = x1.shape
    B2, N, K2 = x2.shape
    assert (B2, K2) == (B, K)
    assert x3.shape == (B, M, N)
    assert N == M, "forward requires square attention map (N == M)"

    # Present x2 as (B, K, N) so the first matmul is a plain (M,K)x(K,N)
    # contraction on the MXU (layout plumbing in the wrapper, not the kernel).
    x2t = jnp.swapaxes(x2, -1, -2)

    return pl.pallas_call(
        _attn_kernel,
        out_shape=jax.ShapeDtypeStruct((B, M, N), x1.dtype),
        grid_spec=pltpu.PrefetchScalarGridSpec(
            num_scalar_prefetch=0,
            grid=(1,),  # single invocation: whole batch fits in VMEM (~1.3 MB)
            in_specs=[
                pl.BlockSpec((B, M, K), lambda i: (0, 0, 0)),
                pl.BlockSpec((B, K, N), lambda i: (0, 0, 0)),
                pl.BlockSpec((B, M, N), lambda i: (0, 0, 0)),
            ],
            out_specs=pl.BlockSpec((B, M, N), lambda i: (0, 0, 0)),
        ),
        compiler_params=pltpu.CompilerParams(
            dimension_semantics=("arbitrary",)),
    )(x1, x2t, x3)


def _reference(x1, x2, x3):
    v1 = jnp.einsum("bmk,bnk->bmn", x1, x2)
    v2 = v1 / x1.shape[-1]
    v3 = v2 + x3
    v4 = jax.nn.softmax(v3, axis=-1)
    return jnp.einsum("bmn,bnp->bmp", v4, x3)


if __name__ == "__main__":
    B, M, K = 2, 128, 512
    N = M  # required for shape consistency of the forward pass

    key = jax.random.PRNGKey(0)
    k1, k2, k3 = jax.random.split(key, 3)
    x1 = jax.random.normal(k1, (B, M, K), dtype=jnp.float32)
    x2 = jax.random.normal(k2, (B, N, K), dtype=jnp.float32)
    x3 = jax.random.normal(k3, (B, M, N), dtype=jnp.float32)

    out = jax.block_until_ready(model_forward(x1, x2, x3))
    ref = jax.block_until_ready(_reference(x1, x2, x3))

    assert out.shape == (B, M, N)
    # approx reciprocal on the softmax denominator -> ~1e-3-level rel error
    assert jnp.allclose(out, ref, atol=5e-3, rtol=5e-3), "mismatch vs reference"

    print("KERNEL_OK")
</pallas_src>

<mosaic_0001>
module attributes {stable_mosaic.version = 11 : i64} {
  func.func @_attn_kernel(%arg0: i32, %arg1: memref<2x128x512xf32, #tpu.memory_space<vmem>>, %arg2: memref<2x512x128xf32, #tpu.memory_space<vmem>>, %arg3: memref<2x128x128xf32, #tpu.memory_space<vmem>>, %arg4: memref<2x128x128xf32, #tpu.memory_space<vmem>>) attributes {dimension_semantics = [#tpu.dimension_semantics<arbitrary>], iteration_bounds = array<i64: 1>, scalar_prefetch = 0 : i64, scratch_operands = 0 : i64, tpu.core_type = #tpu.core_type<tc>, window_params = [{pipeline_mode = #tpu.pipeline_mode<synchronous>, transform_indices = @transform_0, window_bounds = array<i64: 2, 128, 512>}, {pipeline_mode = #tpu.pipeline_mode<synchronous>, transform_indices = @transform_1, window_bounds = array<i64: 2, 512, 128>}, {pipeline_mode = #tpu.pipeline_mode<synchronous>, transform_indices = @transform_2, window_bounds = array<i64: 2, 128, 128>}, {pipeline_mode = #tpu.pipeline_mode<synchronous>, transform_indices = @transform_3, window_bounds = array<i64: 2, 128, 128>}]} {
    %c0 = arith.constant 0 : index
    %c0_0 = arith.constant 0 : index
    %c0_1 = arith.constant 0 : index
    %0 = vector.load %arg1[%c0, %c0_0, %c0_1] : memref<2x128x512xf32, #tpu.memory_space<vmem>>, vector<2x128x512xf32>
    %c0_2 = arith.constant 0 : index
    %c0_3 = arith.constant 0 : index
    %c0_4 = arith.constant 0 : index
    %1 = vector.load %arg2[%c0_2, %c0_3, %c0_4] : memref<2x512x128xf32, #tpu.memory_space<vmem>>, vector<2x512x128xf32>
    %c0_5 = arith.constant 0 : index
    %c0_6 = arith.constant 0 : index
    %c0_7 = arith.constant 0 : index
    %2 = vector.load %arg3[%c0_5, %c0_6, %c0_7] : memref<2x128x128xf32, #tpu.memory_space<vmem>>, vector<2x128x128xf32>
    "tpu.trace_start"() <{level = 10 : i32, message = "bmk,bkn->bmn"}> : () -> ()
    %cst = arith.constant dense<0.000000e+00> : vector<2x128x128xf32>
    %3 = tpu.matmul %0, %1, %cst {dimension_numbers = #tpu.dot_dimension_numbers<[2], [1], [1], [2], [0, 0, 0, 1, 1, 2], [0], [0]>} : vector<2x128x512xf32>, vector<2x512x128xf32>, vector<2x128x128xf32> -> vector<2x128x128xf32>
    "tpu.trace_stop"() : () -> ()
    %cst_8 = arith.constant 0.001953125 : f32
    %4 = vector.broadcast %cst_8 : f32 to vector<2x128x128xf32>
    %5 = arith.mulf %3, %4 : vector<2x128x128xf32>
    %6 = arith.addf %5, %2 : vector<2x128x128xf32>
    %cst_9 = arith.constant dense<0xFF800000> : vector<2x128xf32>
    %7 = vector.multi_reduction <maximumf>, %6, %cst_9 [2] : vector<2x128x128xf32> to vector<2x128xf32>
    %8 = vector.shape_cast %7 : vector<2x128xf32> to vector<2x128x1xf32>
    %9 = vector.broadcast %8 : vector<2x128x1xf32> to vector<2x128x128xf32>
    %10 = arith.subf %6, %9 : vector<2x128x128xf32>
    %11 = math.exp %10 : vector<2x128x128xf32>
    %cst_10 = arith.constant dense<0.000000e+00> : vector<2x128xf32>
    %12 = vector.multi_reduction <add>, %11, %cst_10 [2] : vector<2x128x128xf32> to vector<2x128xf32>
    %13 = vector.shape_cast %12 : vector<2x128xf32> to vector<2x128x1xf32>
    "tpu.trace_start"() <{level = 10 : i32, message = "bmn,bnp->bmp"}> : () -> ()
    %cst_11 = arith.constant dense<0.000000e+00> : vector<2x128x128xf32>
    %14 = tpu.matmul %11, %2, %cst_11 {dimension_numbers = #tpu.dot_dimension_numbers<[2], [1], [1], [2], [0, 0, 0, 1, 1, 2], [0], [0]>} : vector<2x128x128xf32>, vector<2x128x128xf32>, vector<2x128x128xf32> -> vector<2x128x128xf32>
    "tpu.trace_stop"() : () -> ()
    %15 = tpu.reciprocal %13 {approx = true} : vector<2x128x1xf32> -> vector<2x128x1xf32>
    %16 = vector.broadcast %15 : vector<2x128x1xf32> to vector<2x128x128xf32>
    %17 = arith.mulf %14, %16 : vector<2x128x128xf32>
    %c0_12 = arith.constant 0 : index
    %c0_13 = arith.constant 0 : index
    %c0_14 = arith.constant 0 : index
    %18 = vector.load %arg4[%c0_12, %c0_13, %c0_14] : memref<2x128x128xf32, #tpu.memory_space<vmem>>, vector<2x128x128xf32>
    tpu.vector_store %arg4[%c0_12, %c0_13, %c0_14], %17 {strides = array<i32>} : memref<2x128x128xf32, #tpu.memory_space<vmem>>, vector<2x128x128xf32>,
    return
  }
  func.func @transform_0(%arg0: i32) -> (i32, i32, i32) {
    %c0_i32 = arith.constant 0 : i32
    %c0_i32_0 = arith.constant 0 : i32
    %c0_i32_1 = arith.constant 0 : i32
    %c0_i32_2 = arith.constant 0 : i32
    return %c0_i32, %c0_i32_0, %c0_i32_1 : i32, i32, i32
  }
  func.func @transform_1(%arg0: i32) -> (i32, i32, i32) {
    %c0_i32 = arith.constant 0 : i32
    %c0_i32_0 = arith.constant 0 : i32
    %c0_i32_1 = arith.constant 0 : i32
    %c0_i32_2 = arith.constant 0 : i32
    return %c0_i32, %c0_i32_0, %c0_i32_1 : i32, i32, i32
  }
  func.func @transform_2(%arg0: i32) -> (i32, i32, i32) {
    %c0_i32 = arith.constant 0 : i32
    %c0_i32_0 = arith.constant 0 : i32
    %c0_i32_1 = arith.constant 0 : i32
    %c0_i32_2 = arith.constant 0 : i32
    return %c0_i32, %c0_i32_0, %c0_i32_1 : i32, i32, i32
  }
  func.func @transform_3(%arg0: i32) -> (i32, i32, i32) {
    %c0_i32 = arith.constant 0 : i32
    %c0_i32_0 = arith.constant 0 : i32
    %c0_i32_1 = arith.constant 0 : i32
    %c0_i32_2 = arith.constant 0 : i32
    return %c0_i32, %c0_i32_0, %c0_i32_1 : i32, i32, i32
  }
}

</mosaic_0001>

<bundles_post_ra>
// kernel: tpu_custom_call.1
= control target key start
LH: loop header
LB: loop body
LE: loop exit
PB: predicated region body
PF: predicated region fallthrough
CT: control target
= control target key end

     0   :  { %8 = vsyncpa [#allocation3], 0  ;;  %s2725_s0 = inlined_call_operand.hbm [shape: f32[2,128,512], index: 0, kind: input, shape index: {}]   ;;  %s2726_s1 = inlined_call_operand.hbm [shape: f32[2,512,128], index: 1, kind: input, shape index: {}]   ;;  %s2727_s2 = inlined_call_operand.hbm [shape: f32[2,128,128], index: 2, kind: input, shape index: {}]   ;;  %s2728_s3 = inlined_call_operand.hbm [shape: f32[2,128,128], index: 3, kind: output, shape index: {}]  }
   0x1   :  { %9 = vsyncpa [#allocation6], 0 }
   0x2   :  { %10 = vsyncpa [#allocation4], 0  ;;  %s2334_s12 = smov [#allocation5]  }
   0x3   :  { %s28_s13 = sshll.u32 %s2334_s12, 4  ;;  %s29_s13 = int_to_ptr.vmem [resolvable:$true] %s28_s13 }
   0x4   :  { %s2256_s14 = scalar_lea.vmem %s29_s13, 16384  ;;  %p2261_p1 = scmp.lt.s32.totalorder %s29_s13, %s29_s13 }
   0x5   :  { %p2257_p0 = scmp.ne.s32.totalorder %s29_s13, %s2256_s14  ;;  %p2262_p2 = scmp.lt.s32.totalorder %s2256_s14, %s2256_s14 }
   0x7   :  { %p2263_p3 = por %p2262_p2, %p2261_p1 }
   0x9   :  { %p2264_p4 = pnand %p2263_p3, %p2257_p0 }
   0xb   :  { %2267 = shalt.err (!%p2264_p4)
}
   0xc   :  { %s2335_s15 = smov 128   ;;  %s2336_s16 = smov 8  }
   0xd   :  { %34 = dma.hbm_to_vmem [thread:$0]  %s2726_s1, 16384, %s29_s13, [#allocation6], %s2335_s15, %s2335_s15, %s2336_s16  }
   0xe   :  { %s2337_s19 = smov [#allocation2]  }
   0xf   :  { %s16_s20 = sshll.u32 %s2337_s19, 4  ;;  %s17_s20 = int_to_ptr.vmem [resolvable:$true] %s16_s20 }
  0x10   :  { %s2276_s21 = scalar_lea.vmem %s17_s20, 16384  ;;  %p2281_p6 = scmp.lt.s32.totalorder %s17_s20, %s17_s20 }
  0x11   :  { %p2277_p5 = scmp.ne.s32.totalorder %s17_s20, %s2276_s21  ;;  %p2282_p7 = scmp.lt.s32.totalorder %s2276_s21, %s2276_s21 }
  0x13   :  { %p2283_p8 = por %p2282_p7, %p2281_p6 }
  0x15   :  { %p2284_p9 = pnand %p2283_p8, %p2277_p5 }
  0x17   :  { %2287 = shalt.err (!%p2284_p9)
}
  0x18   :  { %s2338_s22 = smov 512   ;;  %s2339_s23 = smov 32  }
  0x19   :  { %22 = dma.hbm_to_vmem [thread:$0]  %s2725_s0, 16384, %s17_s20, [#allocation3], %s2338_s22, %s2338_s22, %s2339_s23  }
  0x1a   :  { %s2340_s26 = smov [#allocation7]  }
  0x1b   :  { %s40_s27 = sshll.u32 %s2340_s26, 4  ;;  %s41_s27 = int_to_ptr.vmem [resolvable:$true] %s40_s27 }
  0x1c   :  { %s2296_s1 = scalar_lea.vmem %s41_s27, 4096  ;;  %p2301_p11 = scmp.lt.s32.totalorder %s41_s27, %s41_s27 }
  0x1d   :  { %p2297_p10 = scmp.ne.s32.totalorder %s41_s27, %s2296_s1  ;;  %p2302_p12 = scmp.lt.s32.totalorder %s2296_s1, %s2296_s1 }
  0x1f   :  { %p2303_p13 = por %p2302_p12, %p2301_p11 }
  0x21   :  { %p2304_p0 = pnand %p2303_p13, %p2297_p10 }
  0x23   :  { %2307 = shalt.err (!%p2304_p0)
}
  0x24   :  { %46 = dma.hbm_to_vmem [thread:$0]  %s2727_s2, 4096, %s41_s27, [#allocation6], %s2335_s15, %s2335_s15, %s2336_s16  }
  0x25   :  { %2328 = dma.done.wait [#allocation3], 16384  }
  0x26   :  { %2329 = vsyncadd [#allocation3], 4294950912 }
  0x27   :  { %2330 = dma.done.wait [#allocation6], 20480  }
  0x28   :  { %2331 = vsyncadd [#allocation6], 4294946816  ;;  %v215_v0 = vld [vmem:[#allocation5 + $0xf8] sm:$0xff]  ;;  %v214_v4 = vld [vmem:[#allocation5 + $0xf0] sm:$0xff]  ;;  %s2341_s0 = smov [#allocation8]  }
  0x29   :  { %v247_v1 = vld [vmem:[#allocation5 + $0x1f8] sm:$0xff]  ;;  %1616 = vmatprep.subr.mxu0 %v215_v0  ;;  %v246_v5 = vld [vmem:[#allocation5 + $0x1f0] sm:$0xff]  ;;  %v213_v8 = vld [vmem:[#allocation5 + $0xe8] sm:$0xff]  ;;  %s1603_s2 = sshll.u32 %s2341_s0, 4  ;;  %s1604_s2 = int_to_ptr.vmem [resolvable:$true] %s1603_s2 }
  0x2a   :  { %v199_v2 = vld [vmem:[#allocation5 + $0x78] sm:$0xff]  ;;  %1696 = vmatprep.subr.mxu1 %v247_v1  ;;  %v198_v6 = vld [vmem:[#allocation5 + $0x70] sm:$0xff]  ;;  %v245_v9 = vld [vmem:[#allocation5 + $0x1e8] sm:$0xff]  ;;  %s2308_s30 = scalar_lea.vmem %s1604_s2, 4096  ;;  %p2313_p2 = scmp.lt.s32.totalorder %s1604_s2, %s1604_s2 }
  0x2b   :  { %v231_v3 = vld [vmem:[#allocation5 + $0x178] sm:$0xff]  ;;  %1617 = vmatpush3.msra.mxu0 %v199_v2  ;;  %v230_v7 = vld [vmem:[#allocation5 + $0x170] sm:$0xff]  ;;  %v197_v10 = vld [vmem:[#allocation5 + $0x68] sm:$0xff]  ;;  %p2309_p1 = scmp.ne.s32.totalorder %s1604_s2, %s2308_s30  ;;  %p2314_p3 = scmp.lt.s32.totalorder %s2308_s30, %s2308_s30 }
  0x2c   :  { %1697 = vmatpush3.msra.mxu1 %v231_v3  ;;  %1618 = vmatprep.subr.mxu0 %v214_v4  ;;  %v229_v11 = vld [vmem:[#allocation5 + $0x168] sm:$0xff]  ;;  %v212_v12 = vld [vmem:[#allocation5 + $0xe0] sm:$0xff]  ;;  %v211_v16 = vld [vmem:[#allocation5 + $0xd8] sm:$0xff] }
  0x2d   :  { %1698 = vmatprep.subr.mxu1 %v246_v5  ;;  %1619 = vmatpush3.msra.mxu0 %v198_v6  ;;  %v244_v13 = vld [vmem:[#allocation5 + $0x1e0] sm:$0xff]  ;;  %v243_v17 = vld [vmem:[#allocation5 + $0x1d8] sm:$0xff]  ;;  %v210_v20 = vld [vmem:[#allocation5 + $0xd0] sm:$0xff]  ;;  %p2315_p4 = por %p2314_p3, %p2313_p2 }
  0x2e   :  { %1699 = vmatpush3.msra.mxu1 %v230_v7  ;;  %1620 = vmatprep.subr.mxu0 %v213_v8  ;;  %v196_v14 = vld [vmem:[#allocation5 + $0x60] sm:$0xff]  ;;  %v195_v18 = vld [vmem:[#allocation5 + $0x58] sm:$0xff]  ;;  %v242_v21 = vld [vmem:[#allocation5 + $0x1d0] sm:$0xff] }
  0x2f   :  { %1700 = vmatprep.subr.mxu1 %v245_v9  ;;  %v228_v15 = vld [vmem:[#allocation5 + $0x160] sm:$0xff]  ;;  %1621 = vmatpush3.msra.mxu0 %v197_v10  ;;  %v227_v19 = vld [vmem:[#allocation5 + $0x158] sm:$0xff]  ;;  %v194_v22 = vld [vmem:[#allocation5 + $0x50] sm:$0xff]  ;;  %p2316_p5 = pnand %p2315_p4, %p2309_p1 }
  0x30   :  { %1701 = vmatpush3.msra.mxu1 %v229_v11  ;;  %1622 = vmatprep.subr.mxu0 %v212_v12  ;;  %v226_v23 = vld [vmem:[#allocation5 + $0x150] sm:$0xff]  ;;  %v209_v24 = vld [vmem:[#allocation5 + $0xc8] sm:$0xff]  ;;  %v208_v28 = vld [vmem:[#allocation5 + $0xc0] sm:$0xff] }
  0x31   :  { %1702 = vmatprep.subr.mxu1 %v244_v13  ;;  %1623 = vmatpush3.msra.mxu0 %v196_v14  ;;  %v241_v25 = vld [vmem:[#allocation5 + $0x1c8] sm:$0xff]  ;;  %v240_v29 = vld [vmem:[#allocation5 + $0x1c0] sm:$0xff]  ;;  %v207_v32 = vld [vmem:[#allocation5 + $0xb8] sm:$0xff] }
  0x32   :  { %1703 = vmatpush3.msra.mxu1 %v228_v15  ;;  %1624 = vmatprep.subr.mxu0 %v211_v16  ;;  %v193_v26 = vld [vmem:[#allocation5 + $0x48] sm:$0xff]  ;;  %v192_v30 = vld [vmem:[#allocation5 + $0x40] sm:$0xff]  ;;  %v239_v33 = vld [vmem:[#allocation5 + $0x1b8] sm:$0xff] }
  0x33   :  { %1704 = vmatprep.subr.mxu1 %v243_v17  ;;  %1625 = vmatpush3.msra.mxu0 %v195_v18  ;;  %v225_v27 = vld [vmem:[#allocation5 + $0x148] sm:$0xff]  ;;  %v224_v31 = vld [vmem:[#allocation5 + $0x140] sm:$0xff]  ;;  %v191_v34 = vld [vmem:[#allocation5 + $0x38] sm:$0xff] }
  0x34   :  { %1705 = vmatpush3.msra.mxu1 %v227_v19  ;;  %1626 = vmatprep.subr.mxu0 %v210_v20  ;;  %v223_v35 = vld [vmem:[#allocation5 + $0x138] sm:$0xff]  ;;  %v206_v36 = vld [vmem:[#allocation5 + $0xb0] sm:$0xff]  ;;  %v205_v40 = vld [vmem:[#allocation5 + $0xa8] sm:$0xff] }
  0x35   :  { %1706 = vmatprep.subr.mxu1 %v242_v21  ;;  %1627 = vmatpush3.msra.mxu0 %v194_v22  ;;  %v238_v37 = vld [vmem:[#allocation5 + $0x1b0] sm:$0xff]  ;;  %v237_v41 = vld [vmem:[#allocation5 + $0x1a8] sm:$0xff]  ;;  %v204_v44 = vld [vmem:[#allocation5 + $0xa0] sm:$0xff] }
  0x36   :  { %1707 = vmatpush3.msra.mxu1 %v226_v23  ;;  %1628 = vmatprep.subr.mxu0 %v209_v24  ;;  %v190_v38 = vld [vmem:[#allocation5 + $0x30] sm:$0xff]  ;;  %v189_v42 = vld [vmem:[#allocation5 + $0x28] sm:$0xff]  ;;  %v236_v45 = vld [vmem:[#allocation5 + $0x1a0] sm:$0xff] }
  0x37   :  { %1708 = vmatprep.subr.mxu1 %v241_v25  ;;  %1629 = vmatpush3.msra.mxu0 %v193_v26  ;;  %v222_v39 = vld [vmem:[#allocation5 + $0x130] sm:$0xff]  ;;  %v221_v43 = vld [vmem:[#allocation5 + $0x128] sm:$0xff]  ;;  %v188_v46 = vld [vmem:[#allocation5 + $0x20] sm:$0xff] }
  0x38   :  { %1709 = vmatpush3.msra.mxu1 %v225_v27  ;;  %1630 = vmatprep.subr.mxu0 %v208_v28  ;;  %v220_v47 = vld [vmem:[#allocation5 + $0x120] sm:$0xff]  ;;  %v203_v48 = vld [vmem:[#allocation5 + $0x98] sm:$0xff]  ;;  %v202_v52 = vld [vmem:[#allocation5 + $0x90] sm:$0xff] }
  0x39   :  { %1710 = vmatprep.subr.mxu1 %v240_v29  ;;  %1631 = vmatpush3.msra.mxu0 %v192_v30  ;;  %v235_v49 = vld [vmem:[#allocation5 + $0x198] sm:$0xff]  ;;  %v234_v53 = vld [vmem:[#allocation5 + $0x190] sm:$0xff]  ;;  %v201_v56 = vld [vmem:[#allocation5 + $0x88] sm:$0xff] }
  0x3a   :  { %1711 = vmatpush3.msra.mxu1 %v224_v31  ;;  %1632 = vmatprep.subr.mxu0 %v207_v32  ;;  %v187_v50 = vld [vmem:[#allocation5 + $0x18] sm:$0xff]  ;;  %v186_v54 = vld [vmem:[#allocation5 + $0x10] sm:$0xff]  ;;  %v233_v57 = vld [vmem:[#allocation5 + $0x188] sm:$0xff] }
  0x3b   :  { %1712 = vmatprep.subr.mxu1 %v239_v33  ;;  %1633 = vmatpush3.msra.mxu0 %v191_v34  ;;  %v219_v51 = vld [vmem:[#allocation5 + $0x118] sm:$0xff]  ;;  %v218_v55 = vld [vmem:[#allocation5 + $0x110] sm:$0xff]  ;;  %v185_v58 = vld [vmem:[#allocation5 + $0x8] sm:$0xff] }
  0x3c   :  { %1713 = vmatpush3.msra.mxu1 %v223_v35  ;;  %1634 = vmatprep.subr.mxu0 %v206_v36  ;;  %v217_v59 = vld [vmem:[#allocation5 + $0x108] sm:$0xff]  ;;  %v200_v60 = vld [vmem:[#allocation5 + $0x80] sm:$0xff]  ;;  %v59_v1 = vld [vmem:[#allocation2 + $0x18] sm:$0xff] }
  0x3d   :  { %1714 = vmatprep.subr.mxu1 %v238_v37  ;;  %1635 = vmatpush3.msra.mxu0 %v190_v38  ;;  %v232_v61 = vld [vmem:[#allocation5 + $0x180] sm:$0xff]  ;;  %v57_v63 = vld [vmem:[#allocation2 + $0x8] sm:$0xff]  ;;  %v58_v3 = vld [vmem:[#allocation2 + $0x10] sm:$0xff] }
  0x3e   :  { %1715 = vmatpush3.msra.mxu1 %v222_v39  ;;  %1636 = vmatprep.subr.mxu0 %v205_v40  ;;  %v184_v62 = vld [vmem:[#allocation5] sm:$0xff]  ;;  %v279_v4 = vld [vmem:[#allocation5 + $0x2f8] sm:$0xff]  ;;  %v61_v8 = vld [vmem:[#allocation2 + $0x28] sm:$0xff] }
  0x3f   :  { %1716 = vmatprep.subr.mxu1 %v237_v41  ;;  %1637 = vmatpush3.msra.mxu0 %v189_v42  ;;  %v216_v0 = vld [vmem:[#allocation5 + $0x100] sm:$0xff]  ;;  %v311_v5 = vld [vmem:[#allocation5 + $0x3f8] sm:$0xff]  ;;  %v62_v11 = vld [vmem:[#allocation2 + $0x30] sm:$0xff] }
  0x40   :  { %1717 = vmatpush3.msra.mxu1 %v221_v43  ;;  %1638 = vmatprep.subr.mxu0 %v204_v44  ;;  %v56_v2 = vld [vmem:[#allocation2] sm:$0xff]  ;;  %v263_v6 = vld [vmem:[#allocation5 + $0x278] sm:$0xff]  ;;  %v278_v12 = vld [vmem:[#allocation5 + $0x2f0] sm:$0xff] }
  0x41   :  { %1718 = vmatprep.subr.mxu1 %v236_v45  ;;  %1639 = vmatpush3.msra.mxu0 %v188_v46  ;;  %v295_v7 = vld [vmem:[#allocation5 + $0x378] sm:$0xff]  ;;  %v60_v10 = vld [vmem:[#allocation2 + $0x20] sm:$0xff]  ;;  %v310_v13 = vld [vmem:[#allocation5 + $0x3f0] sm:$0xff] }
  0x42   :  { %1719 = vmatpush3.msra.mxu1 %v220_v47  ;;  %1640 = vmatprep.subr.mxu0 %v203_v48  ;;  %v63_v9 = vld [vmem:[#allocation2 + $0x38] sm:$0xff]  ;;  %v262_v14 = vld [vmem:[#allocation5 + $0x270] sm:$0xff]  ;;  %v65_v16 = vld [vmem:[#allocation2 + $0x48] sm:$0xff] }
  0x43   :  { %1720 = vmatprep.subr.mxu1 %v235_v49  ;;  %1641 = vmatpush3.msra.mxu0 %v187_v50  ;;  %v294_v15 = vld [vmem:[#allocation5 + $0x370] sm:$0xff]  ;;  %v67_v17 = vld [vmem:[#allocation2 + $0x58] sm:$0xff]  ;;  %v64_v18 = vld [vmem:[#allocation2 + $0x40] sm:$0xff] }
  0x44   :  { %1721 = vmatpush3.msra.mxu1 %v219_v51  ;;  %1642 = vmatprep.subr.mxu0 %v202_v52  ;;  %v66_v19 = vld [vmem:[#allocation2 + $0x50] sm:$0xff]  ;;  %v277_v20 = vld [vmem:[#allocation5 + $0x2e8] sm:$0xff]  ;;  %v71_v25 = vld [vmem:[#allocation2 + $0x78] sm:$0xff] }
  0x45   :  { %1722 = vmatprep.subr.mxu1 %v234_v53  ;;  %1643 = vmatpush3.msra.mxu0 %v186_v54  ;;  %v309_v21 = vld [vmem:[#allocation5 + $0x3e8] sm:$0xff]  ;;  %v68_v26 = vld [vmem:[#allocation2 + $0x60] sm:$0xff]  ;;  %v70_v27 = vld [vmem:[#allocation2 + $0x70] sm:$0xff] }
  0x46   :  { %1723 = vmatpush3.msra.mxu1 %v218_v55  ;;  %1644 = vmatprep.subr.mxu0 %v201_v56  ;;  %v261_v22 = vld [vmem:[#allocation5 + $0x268] sm:$0xff]  ;;  %v276_v28 = vld [vmem:[#allocation5 + $0x2e0] sm:$0xff]  ;;  %v75_v33 = vld [vmem:[#allocation2 + $0x98] sm:$0xff] }
  0x47   :  { %1724 = vmatprep.subr.mxu1 %v233_v57  ;;  %1645 = vmatpush3.msra.mxu0 %v185_v58  ;;  %v293_v23 = vld [vmem:[#allocation5 + $0x368] sm:$0xff]  ;;  %v308_v29 = vld [vmem:[#allocation5 + $0x3e0] sm:$0xff]  ;;  %v74_v35 = vld [vmem:[#allocation2 + $0x90] sm:$0xff] }
  0x48   :  { %1725 = vmatpush3.msra.mxu1 %v217_v59  ;;  %1646 = vmatprep.subr.mxu0 %v200_v60  ;;  %v69_v24 = vld [vmem:[#allocation2 + $0x68] sm:$0xff]  ;;  %v260_v30 = vld [vmem:[#allocation5 + $0x260] sm:$0xff]  ;;  %v275_v36 = vld [vmem:[#allocation5 + $0x2d8] sm:$0xff] }
  0x49   :  { %1726 = vmatprep.subr.mxu1 %v232_v61  ;;  %1647 = vmatpush3.msra.mxu0 %v184_v62  ;;  %v292_v31 = vld [vmem:[#allocation5 + $0x360] sm:$0xff]  ;;  %v73_v32 = vld [vmem:[#allocation2 + $0x88] sm:$0xff]  ;;  %v307_v37 = vld [vmem:[#allocation5 + $0x3d8] sm:$0xff] }
  0x4a   :  { %408 = vmatprep.mubr.f32.mxu0 %v57_v63  ;;  %1727 = vmatpush3.msra.mxu1 %v216_v0  ;;  %v72_v34 = vld [vmem:[#allocation2 + $0x80] sm:$0xff]  ;;  %v259_v38 = vld [vmem:[#allocation5 + $0x258] sm:$0xff]  ;;  %v77_v40 = vld [vmem:[#allocation2 + $0xa8] sm:$0xff] }
  0x4b   :  { %553 = vmatprep.mubr.f32.mxu1 %v59_v1  ;;  %409 = vmatmul.mubr.f32.vlgmr.msra.gmra.mxu0 %v56_v2  ;;  %v291_v39 = vld [vmem:[#allocation5 + $0x358] sm:$0xff]  ;;  %v76_v42 = vld [vmem:[#allocation2 + $0xa0] sm:$0xff]  ;;  %v78_v43 = vld [vmem:[#allocation2 + $0xb0] sm:$0xff] }
  0x4c   :  { %554 = vmatmul.mubr.f32.vlgmr.msra.gmra.mxu1 %v58_v3  ;;  %1776 = vmatprep.subr.mxu0 %v279_v4  ;;  %v79_v41 = vld [vmem:[#allocation2 + $0xb8] sm:$0xff]  ;;  %v274_v44 = vld [vmem:[#allocation5 + $0x2d0] sm:$0xff]  ;;  %v81_v48 = vld [vmem:[#allocation2 + $0xc8] sm:$0xff] }
  0x4d   :  { %1856 = vmatprep.subr.mxu1 %v311_v5  ;;  %1777 = vmatpush3.msra.mxu0 %v263_v6  ;;  %v306_v45 = vld [vmem:[#allocation5 + $0x3d0] sm:$0xff]  ;;  %v83_v49 = vld [vmem:[#allocation2 + $0xd8] sm:$0xff]  ;;  %v80_v50 = vld [vmem:[#allocation2 + $0xc0] sm:$0xff] }
  0x4e   :  { %1857 = vmatpush3.msra.mxu1 %v295_v7  ;;  %413 = vmatprep.mubr.f32.mxu0 %v61_v8  ;;  %v258_v46 = vld [vmem:[#allocation5 + $0x250] sm:$0xff]  ;;  %v273_v52 = vld [vmem:[#allocation5 + $0x2c8] sm:$0xff]  ;;  %v87_v57 = vld [vmem:[#allocation2 + $0xf8] sm:$0xff] }
  0x4f   :  { %558 = vmatprep.mubr.f32.mxu1 %v63_v9  ;;  %414 = vmatmul.mubr.f32.gmra.mxu0 %v60_v10  ;;  %v290_v47 = vld [vmem:[#allocation5 + $0x350] sm:$0xff]  ;;  %v305_v53 = vld [vmem:[#allocation5 + $0x3c8] sm:$0xff]  ;;  %v84_v58 = vld [vmem:[#allocation2 + $0xe0] sm:$0xff] }
  0x50   :  { %559 = vmatmul.mubr.f32.gmra.mxu1 %v62_v11  ;;  %1778 = vmatprep.subr.mxu0 %v278_v12  ;;  %v82_v51 = vld [vmem:[#allocation2 + $0xd0] sm:$0xff]  ;;  %v257_v54 = vld [vmem:[#allocation5 + $0x248] sm:$0xff]  ;;  %v272_v60 = vld [vmem:[#allocation5 + $0x2c0] sm:$0xff] }
  0x51   :  { %1858 = vmatprep.subr.mxu1 %v310_v13  ;;  %1779 = vmatpush3.msra.mxu0 %v262_v14  ;;  %v289_v55 = vld [vmem:[#allocation5 + $0x348] sm:$0xff]  ;;  %v86_v59 = vld [vmem:[#allocation2 + $0xf0] sm:$0xff]  ;;  %v304_v61 = vld [vmem:[#allocation5 + $0x3c0] sm:$0xff] }
  0x52   :  { %1859 = vmatpush3.msra.mxu1 %v294_v15  ;;  %418 = vmatprep.mubr.f32.mxu0 %v65_v16  ;;  %v85_v56 = vld [vmem:[#allocation2 + $0xe8] sm:$0xff]  ;;  %v256_v62 = vld [vmem:[#allocation5 + $0x240] sm:$0xff]  ;;  %v91_v1 = vld [vmem:[#allocation2 + $0x118] sm:$0xff] }
  0x53   :  { %563 = vmatprep.mubr.f32.mxu1 %v67_v17  ;;  %419 = vmatmul.mubr.f32.gmra.mxu0 %v64_v18  ;;  %v288_v63 = vld [vmem:[#allocation5 + $0x340] sm:$0xff]  ;;  %v89_v0 = vld [vmem:[#allocation2 + $0x108] sm:$0xff]  ;;  %v90_v3 = vld [vmem:[#allocation2 + $0x110] sm:$0xff] }
  0x54   :  { %564 = vmatmul.mubr.f32.gmra.mxu1 %v66_v19  ;;  %1780 = vmatprep.subr.mxu0 %v277_v20  ;;  %v88_v2 = vld [vmem:[#allocation2 + $0x100] sm:$0xff]  ;;  %v271_v4 = vld [vmem:[#allocation5 + $0x2b8] sm:$0xff]  ;;  %v93_v8 = vld [vmem:[#allocation2 + $0x128] sm:$0xff] }
  0x55   :  { %1860 = vmatprep.subr.mxu1 %v309_v21  ;;  %1781 = vmatpush3.msra.mxu0 %v261_v22  ;;  %v303_v5 = vld [vmem:[#allocation5 + $0x3b8] sm:$0xff]  ;;  %v92_v10 = vld [vmem:[#allocation2 + $0x120] sm:$0xff]  ;;  %v94_v11 = vld [vmem:[#allocation2 + $0x130] sm:$0xff] }
  0x56   :  { %1861 = vmatpush3.msra.mxu1 %v293_v23  ;;  %423 = vmatprep.mubr.f32.mxu0 %v69_v24  ;;  %v255_v6 = vld [vmem:[#allocation5 + $0x238] sm:$0xff]  ;;  %v270_v12 = vld [vmem:[#allocation5 + $0x2b0] sm:$0xff]  ;;  %v97_v16 = vld [vmem:[#allocation2 + $0x148] sm:$0xff] }
  0x57   :  { %568 = vmatprep.mubr.f32.mxu1 %v71_v25  ;;  %424 = vmatmul.mubr.f32.gmra.mxu0 %v68_v26  ;;  %v287_v7 = vld [vmem:[#allocation5 + $0x338] sm:$0xff]  ;;  %v302_v13 = vld [vmem:[#allocation5 + $0x3b0] sm:$0xff]  ;;  %v96_v18 = vld [vmem:[#allocation2 + $0x140] sm:$0xff] }
  0x58   :  { %569 = vmatmul.mubr.f32.gmra.mxu1 %v70_v27  ;;  %1782 = vmatprep.subr.mxu0 %v276_v28  ;;  %v95_v9 = vld [vmem:[#allocation2 + $0x138] sm:$0xff]  ;;  %v254_v14 = vld [vmem:[#allocation5 + $0x230] sm:$0xff]  ;;  %v269_v20 = vld [vmem:[#allocation5 + $0x2a8] sm:$0xff] }
  0x59   :  { %1862 = vmatprep.subr.mxu1 %v308_v29  ;;  %1783 = vmatpush3.msra.mxu0 %v260_v30  ;;  %v286_v15 = vld [vmem:[#allocation5 + $0x330] sm:$0xff]  ;;  %v99_v17 = vld [vmem:[#allocation2 + $0x158] sm:$0xff]  ;;  %v301_v21 = vld [vmem:[#allocation5 + $0x3a8] sm:$0xff] }
  0x5a   :  { %1863 = vmatpush3.msra.mxu1 %v292_v31  ;;  %428 = vmatprep.mubr.f32.mxu0 %v73_v32  ;;  %v98_v19 = vld [vmem:[#allocation2 + $0x150] sm:$0xff]  ;;  %v253_v22 = vld [vmem:[#allocation5 + $0x228] sm:$0xff]  ;;  %v103_v25 = vld [vmem:[#allocation2 + $0x178] sm:$0xff] }
  0x5b   :  { %573 = vmatprep.mubr.f32.mxu1 %v75_v33  ;;  %429 = vmatmul.mubr.f32.gmra.mxu0 %v72_v34  ;;  %v285_v23 = vld [vmem:[#allocation5 + $0x328] sm:$0xff]  ;;  %v100_v26 = vld [vmem:[#allocation2 + $0x160] sm:$0xff]  ;;  %v102_v27 = vld [vmem:[#allocation2 + $0x170] sm:$0xff] }
  0x5c   :  { %574 = vmatmul.mubr.f32.gmra.mxu1 %v74_v35  ;;  %1784 = vmatprep.subr.mxu0 %v275_v36  ;;  %v101_v24 = vld [vmem:[#allocation2 + $0x168] sm:$0xff]  ;;  %v268_v28 = vld [vmem:[#allocation5 + $0x2a0] sm:$0xff]  ;;  %v107_v33 = vld [vmem:[#allocation2 + $0x198] sm:$0xff] }
  0x5d   :  { %1864 = vmatprep.subr.mxu1 %v307_v37  ;;  %1785 = vmatpush3.msra.mxu0 %v259_v38  ;;  %v300_v29 = vld [vmem:[#allocation5 + $0x3a0] sm:$0xff]  ;;  %v105_v32 = vld [vmem:[#allocation2 + $0x188] sm:$0xff]  ;;  %v106_v35 = vld [vmem:[#allocation2 + $0x190] sm:$0xff] }
  0x5e   :  { %1865 = vmatpush3.msra.mxu1 %v291_v39  ;;  %433 = vmatprep.mubr.f32.mxu0 %v77_v40  ;;  %v252_v30 = vld [vmem:[#allocation5 + $0x220] sm:$0xff]  ;;  %v267_v36 = vld [vmem:[#allocation5 + $0x298] sm:$0xff]  ;;  %v109_v40 = vld [vmem:[#allocation2 + $0x1a8] sm:$0xff] }
  0x5f   :  { %578 = vmatprep.mubr.f32.mxu1 %v79_v41  ;;  %434 = vmatmul.mubr.f32.gmra.mxu0 %v76_v42  ;;  %v284_v31 = vld [vmem:[#allocation5 + $0x320] sm:$0xff]  ;;  %v299_v37 = vld [vmem:[#allocation5 + $0x398] sm:$0xff] }
  0x60   :  { %579 = vmatmul.mubr.f32.gmra.mxu1 %v78_v43  ;;  %1786 = vmatprep.subr.mxu0 %v274_v44  ;;  %v104_v34 = vld [vmem:[#allocation2 + $0x180] sm:$0xff]  ;;  %v251_v38 = vld [vmem:[#allocation5 + $0x218] sm:$0xff]  ;;  %v110_v43 = vld [vmem:[#allocation2 + $0x1b0] sm:$0xff] }
  0x61   :  { %1866 = vmatprep.subr.mxu1 %v306_v45  ;;  %1787 = vmatpush3.msra.mxu0 %v258_v46  ;;  %v283_v39 = vld [vmem:[#allocation5 + $0x318] sm:$0xff]  ;;  %v108_v42 = vld [vmem:[#allocation2 + $0x1a0] sm:$0xff]  ;;  %v266_v44 = vld [vmem:[#allocation5 + $0x290] sm:$0xff] }
  0x62   :  { %1867 = vmatpush3.msra.mxu1 %v290_v47  ;;  %438 = vmatprep.mubr.f32.mxu0 %v81_v48  ;;  %v111_v41 = vld [vmem:[#allocation2 + $0x1b8] sm:$0xff]  ;;  %v298_v45 = vld [vmem:[#allocation5 + $0x390] sm:$0xff]  ;;  %v113_v48 = vld [vmem:[#allocation2 + $0x1c8] sm:$0xff] }
  0x63   :  { %583 = vmatprep.mubr.f32.mxu1 %v83_v49  ;;  %439 = vmatmul.mubr.f32.gmra.mxu0 %v80_v50  ;;  %v250_v46 = vld [vmem:[#allocation5 + $0x210] sm:$0xff]  ;;  %v115_v49 = vld [vmem:[#allocation2 + $0x1d8] sm:$0xff]  ;;  %v112_v50 = vld [vmem:[#allocation2 + $0x1c0] sm:$0xff] }
  0x64   :  { %584 = vmatmul.mubr.f32.gmra.mxu1 %v82_v51  ;;  %1788 = vmatprep.subr.mxu0 %v273_v52  ;;  %v282_v47 = vld [vmem:[#allocation5 + $0x310] sm:$0xff]  ;;  %v265_v52 = vld [vmem:[#allocation5 + $0x288] sm:$0xff] }
  0x65   :  { %1868 = vmatprep.subr.mxu1 %v305_v53  ;;  %1789 = vmatpush3.msra.mxu0 %v257_v54  ;;  %v114_v51 = vld [vmem:[#allocation2 + $0x1d0] sm:$0xff]  ;;  %v297_v53 = vld [vmem:[#allocation5 + $0x388] sm:$0xff] }
  0x66   :  { %1869 = vmatpush3.msra.mxu1 %v289_v55  ;;  %443 = vmatprep.mubr.f32.mxu0 %v85_v56  ;;  %v249_v54 = vld [vmem:[#allocation5 + $0x208] sm:$0xff] }
  0x67   :  { %588 = vmatprep.mubr.f32.mxu1 %v87_v57  ;;  %444 = vmatmul.mubr.f32.gmra.mxu0 %v84_v58  ;;  %v281_v55 = vld [vmem:[#allocation5 + $0x308] sm:$0xff]  ;;  %v119_v57 = vld [vmem:[#allocation2 + $0x1f8] sm:$0xff]  ;;  %v116_v58 = vld [vmem:[#allocation2 + $0x1e0] sm:$0xff] }
  0x68   :  { %589 = vmatmul.mubr.f32.gmra.mxu1 %v86_v59  ;;  %1790 = vmatprep.subr.mxu0 %v272_v60  ;;  %v117_v56 = vld [vmem:[#allocation2 + $0x1e8] sm:$0xff]  ;;  %v118_v59 = vld [vmem:[#allocation2 + $0x1f0] sm:$0xff]  ;;  %v264_v60 = vld [vmem:[#allocation5 + $0x280] sm:$0xff] }
  0x69   :  { %1870 = vmatprep.subr.mxu1 %v304_v61  ;;  %1791 = vmatpush3.msra.mxu0 %v256_v62  ;;  %v296_v61 = vld [vmem:[#allocation5 + $0x380] sm:$0xff] }
  0x6a   :  { %1871 = vmatpush3.msra.mxu1 %v288_v63  ;;  %448 = vmatprep.mubr.f32.mxu0 %v89_v0  ;;  %v248_v62 = vld [vmem:[#allocation5 + $0x200] sm:$0xff]  ;;  %v121_v0 = vld [vmem:[#allocation2 + $0x208] sm:$0xff] }
  0x6b   :  { %593 = vmatprep.mubr.f32.mxu1 %v91_v1  ;;  %449 = vmatmul.mubr.f32.gmra.mxu0 %v88_v2  ;;  %v280_v63 = vld [vmem:[#allocation5 + $0x300] sm:$0xff]  ;;  %v123_v1 = vld [vmem:[#allocation2 + $0x218] sm:$0xff] }
  0x6c   :  { %594 = vmatmul.mubr.f32.gmra.mxu1 %v90_v3  ;;  %1792 = vmatprep.subr.mxu0 %v271_v4  ;;  %v120_v2 = vld [vmem:[#allocation2 + $0x200] sm:$0xff]  ;;  %v122_v3 = vld [vmem:[#allocation2 + $0x210] sm:$0xff]  ;;  %v125_v4 = vld [vmem:[#allocation2 + $0x228] sm:$0xff] }
  0x6d   :  { %1872 = vmatprep.subr.mxu1 %v303_v5  ;;  %1793 = vmatpush3.msra.mxu0 %v255_v6  ;;  %v127_v5 = vld [vmem:[#allocation2 + $0x238] sm:$0xff]  ;;  %v124_v6 = vld [vmem:[#allocation2 + $0x220] sm:$0xff] }
  0x6e   :  { %1873 = vmatpush3.msra.mxu1 %v287_v7  ;;  %453 = vmatprep.mubr.f32.mxu0 %v93_v8  ;;  %v126_v7 = vld [vmem:[#allocation2 + $0x230] sm:$0xff]  ;;  %v129_v8 = vld [vmem:[#allocation2 + $0x248] sm:$0xff] }
  0x6f   :  { %598 = vmatprep.mubr.f32.mxu1 %v95_v9  ;;  %454 = vmatmul.mubr.f32.gmra.mxu0 %v92_v10  ;;  %v131_v9 = vld [vmem:[#allocation2 + $0x258] sm:$0xff]  ;;  %v128_v10 = vld [vmem:[#allocation2 + $0x240] sm:$0xff] }
  0x70   :  { %599 = vmatmul.mubr.f32.gmra.mxu1 %v94_v11  ;;  %1794 = vmatprep.subr.mxu0 %v270_v12  ;;  %v130_v11 = vld [vmem:[#allocation2 + $0x250] sm:$0xff]  ;;  %v133_v12 = vld [vmem:[#allocation2 + $0x268] sm:$0xff] }
  0x71   :  { %1874 = vmatprep.subr.mxu1 %v302_v13  ;;  %1795 = vmatpush3.msra.mxu0 %v254_v14  ;;  %v135_v13 = vld [vmem:[#allocation2 + $0x278] sm:$0xff]  ;;  %v132_v14 = vld [vmem:[#allocation2 + $0x260] sm:$0xff] }
  0x72   :  { %1875 = vmatpush3.msra.mxu1 %v286_v15  ;;  %458 = vmatprep.mubr.f32.mxu0 %v97_v16  ;;  %v134_v15 = vld [vmem:[#allocation2 + $0x270] sm:$0xff]  ;;  %v137_v16 = vld [vmem:[#allocation2 + $0x288] sm:$0xff] }
  0x73   :  { %603 = vmatprep.mubr.f32.mxu1 %v99_v17  ;;  %459 = vmatmul.mubr.f32.gmra.mxu0 %v96_v18  ;;  %v139_v17 = vld [vmem:[#allocation2 + $0x298] sm:$0xff]  ;;  %v136_v18 = vld [vmem:[#allocation2 + $0x280] sm:$0xff] }
  0x74   :  { %604 = vmatmul.mubr.f32.gmra.mxu1 %v98_v19  ;;  %1796 = vmatprep.subr.mxu0 %v269_v20  ;;  %v138_v19 = vld [vmem:[#allocation2 + $0x290] sm:$0xff]  ;;  %v141_v20 = vld [vmem:[#allocation2 + $0x2a8] sm:$0xff] }
  0x75   :  { %1876 = vmatprep.subr.mxu1 %v301_v21  ;;  %1797 = vmatpush3.msra.mxu0 %v253_v22  ;;  %v143_v21 = vld [vmem:[#allocation2 + $0x2b8] sm:$0xff]  ;;  %v140_v22 = vld [vmem:[#allocation2 + $0x2a0] sm:$0xff] }
  0x76   :  { %1877 = vmatpush3.msra.mxu1 %v285_v23  ;;  %463 = vmatprep.mubr.f32.mxu0 %v101_v24  ;;  %v142_v23 = vld [vmem:[#allocation2 + $0x2b0] sm:$0xff]  ;;  %v145_v24 = vld [vmem:[#allocation2 + $0x2c8] sm:$0xff] }
  0x77   :  { %608 = vmatprep.mubr.f32.mxu1 %v103_v25  ;;  %464 = vmatmul.mubr.f32.gmra.mxu0 %v100_v26  ;;  %v147_v25 = vld [vmem:[#allocation2 + $0x2d8] sm:$0xff]  ;;  %v144_v26 = vld [vmem:[#allocation2 + $0x2c0] sm:$0xff] }
  0x78   :  { %609 = vmatmul.mubr.f32.gmra.mxu1 %v102_v27  ;;  %1798 = vmatprep.subr.mxu0 %v268_v28  ;;  %v146_v27 = vld [vmem:[#allocation2 + $0x2d0] sm:$0xff]  ;;  %v149_v28 = vld [vmem:[#allocation2 + $0x2e8] sm:$0xff] }
  0x79   :  { %1878 = vmatprep.subr.mxu1 %v300_v29  ;;  %1799 = vmatpush3.msra.mxu0 %v252_v30  ;;  %v151_v29 = vld [vmem:[#allocation2 + $0x2f8] sm:$0xff]  ;;  %v148_v30 = vld [vmem:[#allocation2 + $0x2e0] sm:$0xff] }
  0x7a   :  { %1879 = vmatpush3.msra.mxu1 %v284_v31  ;;  %468 = vmatprep.mubr.f32.mxu0 %v105_v32  ;;  %v150_v31 = vld [vmem:[#allocation2 + $0x2f0] sm:$0xff]  ;;  %v153_v32 = vld [vmem:[#allocation2 + $0x308] sm:$0xff] }
  0x7b   :  { %613 = vmatprep.mubr.f32.mxu1 %v107_v33  ;;  %469 = vmatmul.mubr.f32.gmra.mxu0 %v104_v34  ;;  %v155_v33 = vld [vmem:[#allocation2 + $0x318] sm:$0xff]  ;;  %v152_v34 = vld [vmem:[#allocation2 + $0x300] sm:$0xff] }
  0x7c   :  { %614 = vmatmul.mubr.f32.gmra.mxu1 %v106_v35  ;;  %1800 = vmatprep.subr.mxu0 %v267_v36  ;;  %v154_v35 = vld [vmem:[#allocation2 + $0x310] sm:$0xff]  ;;  %v157_v36 = vld [vmem:[#allocation2 + $0x328] sm:$0xff] }
  0x7d   :  { %1880 = vmatprep.subr.mxu1 %v299_v37  ;;  %1801 = vmatpush3.msra.mxu0 %v251_v38  ;;  %v159_v37 = vld [vmem:[#allocation2 + $0x338] sm:$0xff]  ;;  %v156_v38 = vld [vmem:[#allocation2 + $0x320] sm:$0xff] }
  0x7e   :  { %1881 = vmatpush3.msra.mxu1 %v283_v39  ;;  %473 = vmatprep.mubr.f32.mxu0 %v109_v40  ;;  %v158_v39 = vld [vmem:[#allocation2 + $0x330] sm:$0xff]  ;;  %v161_v40 = vld [vmem:[#allocation2 + $0x348] sm:$0xff] }
  0x7f   :  { %618 = vmatprep.mubr.f32.mxu1 %v111_v41  ;;  %474 = vmatmul.mubr.f32.gmra.mxu0 %v108_v42  ;;  %v163_v41 = vld [vmem:[#allocation2 + $0x358] sm:$0xff]  ;;  %v160_v42 = vld [vmem:[#allocation2 + $0x340] sm:$0xff] }
  0x80   :  { %619 = vmatmul.mubr.f32.gmra.mxu1 %v110_v43  ;;  %1802 = vmatprep.subr.mxu0 %v266_v44  ;;  %v162_v43 = vld [vmem:[#allocation2 + $0x350] sm:$0xff]  ;;  %v165_v44 = vld [vmem:[#allocation2 + $0x368] sm:$0xff] }
  0x81   :  { %1882 = vmatprep.subr.mxu1 %v298_v45  ;;  %1803 = vmatpush3.msra.mxu0 %v250_v46  ;;  %v167_v45 = vld [vmem:[#allocation2 + $0x378] sm:$0xff]  ;;  %v164_v46 = vld [vmem:[#allocation2 + $0x360] sm:$0xff] }
  0x82   :  { %1883 = vmatpush3.msra.mxu1 %v282_v47  ;;  %478 = vmatprep.mubr.f32.mxu0 %v113_v48  ;;  %v166_v47 = vld [vmem:[#allocation2 + $0x370] sm:$0xff]  ;;  %v169_v48 = vld [vmem:[#allocation2 + $0x388] sm:$0xff] }
  0x83   :  { %623 = vmatprep.mubr.f32.mxu1 %v115_v49  ;;  %479 = vmatmul.mubr.f32.gmra.mxu0 %v112_v50  ;;  %v171_v49 = vld [vmem:[#allocation2 + $0x398] sm:$0xff]  ;;  %v168_v50 = vld [vmem:[#allocation2 + $0x380] sm:$0xff] }
  0x84   :  { %624 = vmatmul.mubr.f32.gmra.mxu1 %v114_v51  ;;  %1804 = vmatprep.subr.mxu0 %v265_v52  ;;  %v170_v51 = vld [vmem:[#allocation2 + $0x390] sm:$0xff]  ;;  %v173_v52 = vld [vmem:[#allocation2 + $0x3a8] sm:$0xff] }
  0x85   :  { %1884 = vmatprep.subr.mxu1 %v297_v53  ;;  %1805 = vmatpush3.msra.mxu0 %v249_v54  ;;  %v175_v53 = vld [vmem:[#allocation2 + $0x3b8] sm:$0xff]  ;;  %v172_v54 = vld [vmem:[#allocation2 + $0x3a0] sm:$0xff] }
  0x86   :  { %1885 = vmatpush3.msra.mxu1 %v281_v55  ;;  %483 = vmatprep.mubr.f32.mxu0 %v117_v56  ;;  %v174_v55 = vld [vmem:[#allocation2 + $0x3b0] sm:$0xff]  ;;  %v177_v56 = vld [vmem:[#allocation2 + $0x3c8] sm:$0xff] }
  0x87   :  { %628 = vmatprep.mubr.f32.mxu1 %v119_v57  ;;  %484 = vmatmul.mubr.f32.gmra.mxu0 %v116_v58  ;;  %v179_v57 = vld [vmem:[#allocation2 + $0x3d8] sm:$0xff]  ;;  %v176_v58 = vld [vmem:[#allocation2 + $0x3c0] sm:$0xff] }
  0x88   :  { %629 = vmatmul.mubr.f32.gmra.mxu1 %v118_v59  ;;  %1806 = vmatprep.subr.mxu0 %v264_v60  ;;  %v178_v59 = vld [vmem:[#allocation2 + $0x3d0] sm:$0xff]  ;;  %v181_v60 = vld [vmem:[#allocation2 + $0x3e8] sm:$0xff] }
  0x89   :  { %1886 = vmatprep.subr.mxu1 %v296_v61  ;;  %1807 = vmatpush3.msra.mxu0 %v248_v62  ;;  %v183_v61 = vld [vmem:[#allocation2 + $0x3f8] sm:$0xff]  ;;  %v180_v62 = vld [vmem:[#allocation2 + $0x3e0] sm:$0xff] }
  0x8a   :  { %1887 = vmatpush3.msra.mxu1 %v280_v63  ;;  %698 = vmatprep.mubr.f32.mxu0 %v121_v0  ;;  %v182_v63 = vld [vmem:[#allocation2 + $0x3f0] sm:$0xff]  ;;  %v2377_v0 = vld [vmem:[#allocation7 + $0x78] sm:$0xff] }
  0x8b   :  { %843 = vmatprep.mubr.f32.mxu1 %v123_v1  ;;  %699 = vmatmul.mubr.f32.vlgmr.msra.gmra.mxu0 %v120_v2  ;;  %2751 = vst [vmem:[#allocation12_spill] sm:$0xff] %v2377_v0  ;;  %v2380_v1 = vld [vmem:[#allocation7 + $0x70] sm:$0xff]  ;;  %v2384_v2 = vld [vmem:[#allocation7 + $0x68] sm:$0xff] }
  0x8c   :  { %844 = vmatmul.mubr.f32.vlgmr.msra.gmra.mxu1 %v122_v3  ;;  %703 = vmatprep.mubr.f32.mxu0 %v125_v4  ;;  %2752 = vst [vmem:[#allocation13_spill] sm:$0xff] %v2380_v1  ;;  %2753 = vst [vmem:[#allocation14_spill] sm:$0xff] %v2384_v2  ;;  %v2388_v3 = vld [vmem:[#allocation7 + $0x60] sm:$0xff]  ;;  %v2392_v4 = vld [vmem:[#allocation7 + $0x58] sm:$0xff] }
  0x8d   :  { %848 = vmatprep.mubr.f32.mxu1 %v127_v5  ;;  %2000 = vmatprep.subr.mxu0 %v2377_v0  ;;  %v2396_v5 = vld [vmem:[#allocation7 + $0x50] sm:$0xff] }
  0x8e   :  { %2001 = vmatpush3.msra.mxu0 %v2377_v0 }
  0x8f   :  { %704 = vmatmul.mubr.f32.gmra.mxu0 %v124_v6  ;;  %2002 = vmatprep.subr.mxu0 %v2380_v1  ;;  %v2400_v6 = vld [vmem:[#allocation7 + $0x48] sm:$0xff] }
  0x90   :  { %849 = vmatmul.mubr.f32.gmra.mxu1 %v126_v7  ;;  %708 = vmatprep.mubr.f32.mxu0 %v129_v8  ;;  %v2404_v7 = vld [vmem:[#allocation7 + $0x40] sm:$0xff]  ;;  %v2408_v8 = vld [vmem:[#allocation7 + $0x38] sm:$0xff] }
  0x91   :  { %853 = vmatprep.mubr.f32.mxu1 %v131_v9  ;;  %2003 = vmatpush3.msra.mxu0 %v2380_v1  ;;  %v2412_v9 = vld [vmem:[#allocation7 + $0x30] sm:$0xff] }
  0x92   :  { %2004 = vmatprep.subr.mxu0 %v2384_v2 }
  0x93   :  { %709 = vmatmul.mubr.f32.gmra.mxu0 %v128_v10  ;;  %v2416_v10 = vld [vmem:[#allocation7 + $0x28] sm:$0xff] }
  0x94   :  { %854 = vmatmul.mubr.f32.gmra.mxu1 %v130_v11  ;;  %713 = vmatprep.mubr.f32.mxu0 %v133_v12  ;;  %v2420_v11 = vld [vmem:[#allocation7 + $0x20] sm:$0xff]  ;;  %v2424_v12 = vld [vmem:[#allocation7 + $0x18] sm:$0xff] }
  0x95   :  { %858 = vmatprep.mubr.f32.mxu1 %v135_v13  ;;  %2005 = vmatpush3.msra.mxu0 %v2384_v2  ;;  %v2428_v13 = vld [vmem:[#allocation7 + $0x10] sm:$0xff] }
  0x96   :  { %2006 = vmatprep.subr.mxu0 %v2388_v3 }
  0x97   :  { %714 = vmatmul.mubr.f32.gmra.mxu0 %v132_v14  ;;  %v313_v14 = vld [vmem:[#allocation7 + $0x8] sm:$0xff] }
  0x98   :  { %859 = vmatmul.mubr.f32.gmra.mxu1 %v134_v15  ;;  %718 = vmatprep.mubr.f32.mxu0 %v137_v16  ;;  %v312_v15 = vld [vmem:[#allocation7] sm:$0xff] }
  0x99   :  { %863 = vmatprep.mubr.f32.mxu1 %v139_v17  ;;  %2007 = vmatpush3.msra.mxu0 %v2388_v3 }
  0x9a   :  { %2008 = vmatprep.subr.mxu0 %v2392_v4 }
  0x9b   :  { %719 = vmatmul.mubr.f32.gmra.mxu0 %v136_v18 }
  0x9c   :  { %864 = vmatmul.mubr.f32.gmra.mxu1 %v138_v19  ;;  %723 = vmatprep.mubr.f32.mxu0 %v141_v20 }
  0x9d   :  { %868 = vmatprep.mubr.f32.mxu1 %v143_v21  ;;  %2009 = vmatpush3.msra.mxu0 %v2392_v4 }
  0x9e   :  { %2010 = vmatprep.subr.mxu0 %v2396_v5 }
  0x9f   :  { %724 = vmatmul.mubr.f32.gmra.mxu0 %v140_v22  ;;  %v2433_v22 = vld [vmem:[#allocation7 + $0xf8] sm:$0xff] }
  0xa0   :  { %869 = vmatmul.mubr.f32.gmra.mxu1 %v142_v23  ;;  %728 = vmatprep.mubr.f32.mxu0 %v145_v24  ;;  %2754 = vst [vmem:[#allocation15_spill] sm:$0xff] %v2433_v22 }
  0xa1   :  { %873 = vmatprep.mubr.f32.mxu1 %v147_v25  ;;  %2011 = vmatpush3.msra.mxu0 %v2396_v5 }
  0xa2   :  { %2012 = vmatprep.subr.mxu0 %v2400_v6  ;;  %2056 = vmatprep.subr.mxu1 %v2433_v22 }
  0xa3   :  { %729 = vmatmul.mubr.f32.gmra.mxu0 %v144_v26  ;;  %v2436_v26 = vld [vmem:[#allocation7 + $0xf0] sm:$0xff]  ;;  %2057 = vmatpush3.msra.mxu1 %v2433_v22 }
  0xa4   :  { %874 = vmatmul.mubr.f32.gmra.mxu1 %v146_v27  ;;  %733 = vmatprep.mubr.f32.mxu0 %v149_v28  ;;  %2755 = vst [vmem:[#allocation16_spill] sm:$0xff] %v2436_v26 }
  0xa5   :  { %878 = vmatprep.mubr.f32.mxu1 %v151_v29  ;;  %2013 = vmatpush3.msra.mxu0 %v2400_v6 }
  0xa6   :  { %2014 = vmatprep.subr.mxu0 %v2404_v7  ;;  %2058 = vmatprep.subr.mxu1 %v2436_v26 }
  0xa7   :  { %734 = vmatmul.mubr.f32.gmra.mxu0 %v148_v30  ;;  %2059 = vmatpush3.msra.mxu1 %v2436_v26 }
  0xa8   :  { %879 = vmatmul.mubr.f32.gmra.mxu1 %v150_v31  ;;  %738 = vmatprep.mubr.f32.mxu0 %v153_v32  ;;  %v2440_v32 = vld [vmem:[#allocation7 + $0xe8] sm:$0xff] }
  0xa9   :  { %883 = vmatprep.mubr.f32.mxu1 %v155_v33  ;;  %2015 = vmatpush3.msra.mxu0 %v2404_v7  ;;  %2756 = vst [vmem:[#allocation17_spill] sm:$0xff] %v2440_v32 }
  0xaa   :  { %2016 = vmatprep.subr.mxu0 %v2408_v8  ;;  %2060 = vmatprep.subr.mxu1 %v2440_v32 }
  0xab   :  { %739 = vmatmul.mubr.f32.gmra.mxu0 %v152_v34  ;;  %2061 = vmatpush3.msra.mxu1 %v2440_v32 }
  0xac   :  { %884 = vmatmul.mubr.f32.gmra.mxu1 %v154_v35  ;;  %743 = vmatprep.mubr.f32.mxu0 %v157_v36 }
  0xad   :  { %888 = vmatprep.mubr.f32.mxu1 %v159_v37  ;;  %2017 = vmatpush3.msra.mxu0 %v2408_v8  ;;  %v2446_v37 = vld [vmem:[#allocation7 + $0xe0] sm:$0xff] }
  0xae   :  { %2018 = vmatprep.subr.mxu0 %v2412_v9  ;;  %2758 = vst [vmem:[#allocation19_spill] sm:$0xff] %v2446_v37  ;;  %2062 = vmatprep.subr.mxu1 %v2446_v37 }
  0xaf   :  { %744 = vmatmul.mubr.f32.gmra.mxu0 %v156_v38  ;;  %2063 = vmatpush3.msra.mxu1 %v2446_v37 }
  0xb0   :  { %889 = vmatmul.mubr.f32.gmra.mxu1 %v158_v39  ;;  %748 = vmatprep.mubr.f32.mxu0 %v161_v40 }
  0xb1   :  { %893 = vmatprep.mubr.f32.mxu1 %v163_v41  ;;  %2019 = vmatpush3.msra.mxu0 %v2412_v9 }
  0xb2   :  { %2020 = vmatprep.subr.mxu0 %v2416_v10 }
  0xb3   :  { %749 = vmatmul.mubr.f32.gmra.mxu0 %v160_v42 }
  0xb4   :  { %894 = vmatmul.mubr.f32.gmra.mxu1 %v162_v43  ;;  %753 = vmatprep.mubr.f32.mxu0 %v165_v44  ;;  %v2451_v43 = vld [vmem:[#allocation7 + $0xd8] sm:$0xff] }
  0xb5   :  { %898 = vmatprep.mubr.f32.mxu1 %v167_v45  ;;  %2021 = vmatpush3.msra.mxu0 %v2416_v10  ;;  %2759 = vst [vmem:[#allocation20_spill] sm:$0xff] %v2451_v43 }
  0xb6   :  { %2022 = vmatprep.subr.mxu0 %v2420_v11  ;;  %2064 = vmatprep.subr.mxu1 %v2451_v43 }
  0xb7   :  { %754 = vmatmul.mubr.f32.gmra.mxu0 %v164_v46  ;;  %2065 = vmatpush3.msra.mxu1 %v2451_v43 }
  0xb8   :  { %899 = vmatmul.mubr.f32.gmra.mxu1 %v166_v47  ;;  %758 = vmatprep.mubr.f32.mxu0 %v169_v48  ;;  %v2457_v48 = vld [vmem:[#allocation7 + $0xd0] sm:$0xff] }
  0xb9   :  { %903 = vmatprep.mubr.f32.mxu1 %v171_v49  ;;  %2023 = vmatpush3.msra.mxu0 %v2420_v11  ;;  %2761 = vst [vmem:[#allocation22_spill] sm:$0xff] %v2457_v48 }
  0xba   :  { %2024 = vmatprep.subr.mxu0 %v2424_v12  ;;  %2066 = vmatprep.subr.mxu1 %v2457_v48 }
  0xbb   :  { %759 = vmatmul.mubr.f32.gmra.mxu0 %v168_v50  ;;  %2067 = vmatpush3.msra.mxu1 %v2457_v48 }
  0xbc   :  { %904 = vmatmul.mubr.f32.gmra.mxu1 %v170_v51  ;;  %763 = vmatprep.mubr.f32.mxu0 %v173_v52 }
  0xbd   :  { %908 = vmatprep.mubr.f32.mxu1 %v175_v53  ;;  %2025 = vmatpush3.msra.mxu0 %v2424_v12 }
  0xbe   :  { %2026 = vmatprep.subr.mxu0 %v2428_v13 }
  0xbf   :  { %764 = vmatmul.mubr.f32.gmra.mxu0 %v172_v54  ;;  %v2462_v54 = vld [vmem:[#allocation7 + $0xc8] sm:$0xff] }
  0xc0   :  { %909 = vmatmul.mubr.f32.gmra.mxu1 %v174_v55  ;;  %768 = vmatprep.mubr.f32.mxu0 %v177_v56  ;;  %2762 = vst [vmem:[#allocation23_spill] sm:$0xff] %v2462_v54 }
  0xc1   :  { %913 = vmatprep.mubr.f32.mxu1 %v179_v57  ;;  %2027 = vmatpush3.msra.mxu0 %v2428_v13 }
  0xc2   :  { %2028 = vmatprep.subr.mxu0 %v313_v14  ;;  %2068 = vmatprep.subr.mxu1 %v2462_v54 }
  0xc3   :  { %769 = vmatmul.mubr.f32.gmra.mxu0 %v176_v58  ;;  %2069 = vmatpush3.msra.mxu1 %v2462_v54 }
  0xc4   :  { %914 = vmatmul.mubr.f32.gmra.mxu1 %v178_v59  ;;  %773 = vmatprep.mubr.f32.mxu0 %v181_v60  ;;  %v2469_v59 = vld [vmem:[#allocation7 + $0xc0] sm:$0xff] }
  0xc5   :  { %918 = vmatprep.mubr.f32.mxu1 %v183_v61  ;;  %2029 = vmatpush3.msra.mxu0 %v313_v14  ;;  %2764 = vst [vmem:[#allocation25_spill] sm:$0xff] %v2469_v59 }
  0xc6   :  { %2030 = vmatprep.subr.mxu0 %v312_v15  ;;  %2070 = vmatprep.subr.mxu1 %v2469_v59 }
  0xc7   :  { %774 = vmatmul.mubr.f32.gmra.mxu0 %v180_v62  ;;  %2071 = vmatpush3.msra.mxu1 %v2469_v59 }
  0xc8   :  { %919 = vmatmul.mubr.f32.gmra.mxu1 %v182_v63  ;;  %2031 = vmatpush3.msra.mxu0 %v312_v15 }
 0x10b   :  { %v1648_v16 = vpop.f32.mrf.mxu0 }
 0x10c   :  { %v1728_v17 = vpop.f32.mrf.mxu1 }
 0x10d   :  { %v1649_v18 = vpop.f32.mrf.mxu0 }
 0x10e   :  { %v1729_v19 = vpop.f32.mrf.mxu1  ;;  %v1650_v20 = vadd.f32 %v1649_v18, %v1648_v16 }
 0x10f   :  { %v1730_v21 = vadd.f32 %v1729_v19, %v1728_v17  ;;  %v1651_v23 = vpop.f32.mrf.mxu0  ;;  %v2481_v19 = vld [vmem:[#allocation7 + $0xb0] sm:$0xff] }
 0x110   :  { %v1731_v24 = vpop.f32.mrf.mxu1  ;;  %2767 = vst [vmem:[#allocation28_spill] sm:$0xff] %v2481_v19 }
 0x111   :  { %v556_v25 = vadd.f32 %v1730_v21, %v1650_v20  ;;  %v1652_v27 = vpop.f32.mrf.mxu0 }
 0x112   :  { %v1732_v28 = vpop.f32.mrf.mxu1  ;;  %v1653_v30 = vadd.f32 %v1652_v27, %v1651_v23  ;;  %v2486_v27 = vld [vmem:[#allocation7 + $0xa8] sm:$0xff] }
 0x113   :  { %v924_v29 = vmul.f32 0.001953125, %v556_v25  ;;  %v1733_v31 = vadd.f32 %v1732_v28, %v1731_v24  ;;  %v1654_v33 = vpop.f32.mrf.mxu0  ;;  %2768 = vst [vmem:[#allocation29_spill] sm:$0xff] %v2486_v27 }
 0x114   :  { %v1734_v34 = vpop.f32.mrf.mxu1 }
 0x115   :  { %v561_v35 = vadd.f32 %v1733_v31, %v1653_v30  ;;  %v2444_v36 = vadd.f32 %v924_v29, %v312_v15  ;;  %v1655_v38 = vpop.f32.mrf.mxu0  ;;  %v2474_v15 = vld [vmem:[#allocation7 + $0xb8] sm:$0xff]  ;;  %v2493_v31 = vld [vmem:[#allocation7 + $0xa0] sm:$0xff] }
 0x116   :  { %v1735_v39 = vpop.f32.mrf.mxu1  ;;  %v1656_v41 = vadd.f32 %v1655_v38, %v1654_v33  ;;  %2765 = vst [vmem:[#allocation26_spill] sm:$0xff] %v2474_v15  ;;  %2072 = vmatprep.subr.mxu1 %v2474_v15 }
 0x117   :  { %2757 = vst [vmem:[#allocation18_spill] sm:$0xff] %v2444_v36  ;;  %v925_v40 = vmul.f32 0.001953125, %v561_v35  ;;  %v1736_v42 = vadd.f32 %v1735_v39, %v1734_v34  ;;  %988 = vmax.xlane.f32.xlu0 %v2444_v36  ;;  %v1657_v44 = vpop.f32.mrf.mxu0  ;;  %2073 = vmatpush3.msra.mxu1 %v2474_v15 }
 0x118   :  { %v1737_v45 = vpop.f32.mrf.mxu1  ;;  %2074 = vmatprep.subr.mxu1 %v2481_v19 }
 0x119   :  { %v566_v46 = vadd.f32 %v1736_v42, %v1656_v41  ;;  %v2455_v47 = vadd.f32 %v925_v40, %v313_v14  ;;  %v1658_v49 = vpop.f32.mrf.mxu0  ;;  %2075 = vmatpush3.msra.mxu1 %v2481_v19  ;;  %v2498_v40 = vld [vmem:[#allocation7 + $0x98] sm:$0xff] }
 0x11a   :  { %v1738_v50 = vpop.f32.mrf.mxu1  ;;  %v1659_v52 = vadd.f32 %v1658_v49, %v1657_v44  ;;  %2076 = vmatprep.subr.mxu1 %v2486_v27 }
 0x11b   :  { %2760 = vst [vmem:[#allocation21_spill] sm:$0xff] %v2455_v47  ;;  %v926_v51 = vmul.f32 0.001953125, %v566_v46  ;;  %v1739_v53 = vadd.f32 %v1738_v50, %v1737_v45  ;;  %990 = vmax.xlane.f32.xlu1 %v2455_v47  ;;  %v1660_v55 = vpop.f32.mrf.mxu0  ;;  %2077 = vmatpush3.msra.mxu1 %v2486_v27  ;;  %v2505_v45 = vld [vmem:[#allocation7 + $0x90] sm:$0xff] }
 0x11c   :  { %v1740_v56 = vpop.f32.mrf.mxu1  ;;  %2078 = vmatprep.subr.mxu1 %v2493_v31 }
 0x11d   :  { %v571_v57 = vadd.f32 %v1739_v53, %v1659_v52  ;;  %v2467_v58 = vadd.f32 %v926_v51, %v2428_v13  ;;  %v1661_v60 = vpop.f32.mrf.mxu0  ;;  %2079 = vmatpush3.msra.mxu1 %v2493_v31  ;;  %v2510_v53 = vld [vmem:[#allocation7 + $0x88] sm:$0xff] }
 0x11e   :  { %v1741_v61 = vpop.f32.mrf.mxu1  ;;  %v1662_v63 = vadd.f32 %v1661_v60, %v1660_v55  ;;  %2080 = vmatprep.subr.mxu1 %v2498_v40  ;;  %v2517_v60 = vld [vmem:[#allocation7 + $0x80] sm:$0xff] }
 0x11f   :  { %2763 = vst [vmem:[#allocation24_spill] sm:$0xff] %v2467_v58  ;;  %v927_v62 = vmul.f32 0.001953125, %v571_v57  ;;  %v1742_v14 = vadd.f32 %v1741_v61, %v1740_v56  ;;  %992 = vmax.xlane.f32.xlu0 %v2467_v58  ;;  %v1663_v16 = vpop.f32.mrf.mxu0  ;;  %2081 = vmatpush3.msra.mxu1 %v2498_v40 }
 0x120   :  { %v1743_v13 = vpop.f32.mrf.mxu1  ;;  %2082 = vmatprep.subr.mxu1 %v2505_v45 }
 0x121   :  { %v576_v17 = vadd.f32 %v1742_v14, %v1662_v63  ;;  %v2479_v18 = vadd.f32 %v927_v62, %v2424_v12  ;;  %v1664_v20 = vpop.f32.mrf.mxu0  ;;  %2083 = vmatpush3.msra.mxu1 %v2505_v45 }
 0x122   :  { %v1744_v21 = vpop.f32.mrf.mxu1  ;;  %v1665_v24 = vadd.f32 %v1664_v20, %v1663_v16  ;;  %2084 = vmatprep.subr.mxu1 %v2510_v53 }
 0x123   :  { %2766 = vst [vmem:[#allocation27_spill] sm:$0xff] %v2479_v18  ;;  %v928_v23 = vmul.f32 0.001953125, %v576_v17  ;;  %v1745_v25 = vadd.f32 %v1744_v21, %v1743_v13  ;;  %994 = vmax.xlane.f32.xlu0 %v2479_v18  ;;  %v1666_v28 = vpop.f32.mrf.mxu0  ;;  %2085 = vmatpush3.msra.mxu1 %v2510_v53 }
 0x124   :  { %v1746_v12 = vpop.f32.mrf.mxu1  ;;  %2086 = vmatprep.subr.mxu1 %v2517_v60 }
 0x125   :  { %v581_v29 = vadd.f32 %v1745_v25, %v1665_v24  ;;  %v2491_v30 = vadd.f32 %v928_v23, %v2420_v11  ;;  %v1667_v33 = vpop.f32.mrf.mxu0  ;;  %2087 = vmatpush3.msra.mxu1 %v2517_v60 }
 0x126   :  { %v1747_v34 = vpop.f32.mrf.mxu1  ;;  %v1668_v38 = vadd.f32 %v1667_v33, %v1666_v28 }
 0x127   :  { %2769 = vst [vmem:[#allocation30_spill] sm:$0xff] %v2491_v30  ;;  %v929_v35 = vmul.f32 0.001953125, %v581_v29  ;;  %v1748_v39 = vadd.f32 %v1747_v34, %v1746_v12  ;;  %996 = vmax.xlane.f32.xlu0 %v2491_v30  ;;  %v1669_v41 = vpop.f32.mrf.mxu0 }
 0x128   :  { %v1749_v11 = vpop.f32.mrf.mxu1 }
 0x129   :  { %v586_v42 = vadd.f32 %v1748_v39, %v1668_v38  ;;  %v2503_v44 = vadd.f32 %v929_v35, %v2416_v10  ;;  %v1670_v46 = vpop.f32.mrf.mxu0 }
 0x12a   :  { %v1750_v49 = vpop.f32.mrf.mxu1  ;;  %v1671_v51 = vadd.f32 %v1670_v46, %v1669_v41 }
 0x12b   :  { %2770 = vst [vmem:[#allocation31_spill] sm:$0xff] %v2503_v44  ;;  %v930_v50 = vmul.f32 0.001953125, %v586_v42  ;;  %v1751_v52 = vadd.f32 %v1750_v49, %v1749_v11  ;;  %998 = vmax.xlane.f32.xlu0 %v2503_v44  ;;  %v1672_v55 = vpop.f32.mrf.mxu0 }
 0x12c   :  { %v1752_v10 = vpop.f32.mrf.mxu1 }
 0x12d   :  { %v591_v56 = vadd.f32 %v1751_v52, %v1671_v51  ;;  %v2515_v57 = vadd.f32 %v930_v50, %v2412_v9  ;;  %v1673_v61 = vpop.f32.mrf.mxu0 }
 0x12e   :  { %v1753_v62 = vpop.f32.mrf.mxu1 }
 0x12f   :  { %2771 = vst [vmem:[#allocation32_spill] sm:$0xff] %v2515_v57  ;;  %v931_v63 = vmul.f32 0.001953125, %v591_v56  ;;  %1000 = vmax.xlane.f32.xlu0 %v2515_v57  ;;  %v1675_v14 = vpop.f32.mrf.mxu0  ;;  %v1754_v57 = vadd.f32 %v1753_v62, %v1752_v10 }
 0x130   :  { %v1755_v16 = vpop.f32.mrf.mxu1 }
 0x131   :  { %v2524_v13 = vadd.f32 %v931_v63, %v2408_v8  ;;  %v1676_v9 = vpop.f32.mrf.mxu0 }
 0x132   :  { %v1756_v17 = vpop.f32.mrf.mxu1  ;;  %v1677_v26 = vadd.f32 %v1676_v9, %v1675_v14 }
 0x133   :  { %2772 = vst [vmem:[#allocation33_spill] sm:$0xff] %v2524_v13  ;;  %1002 = vmax.xlane.f32.xlu0 %v2524_v13  ;;  %v1678_v20 = vpop.f32.mrf.mxu0  ;;  %v1674_v13 = vadd.f32 %v1673_v61, %v1672_v55  ;;  %v1757_v32 = vadd.f32 %v1756_v17, %v1755_v16 }
 0x134   :  { %v1758_v21 = vpop.f32.mrf.mxu1 }
 0x135   :  { %v1679_v23 = vpop.f32.mrf.mxu0  ;;  %v596_v22 = vadd.f32 %v1754_v57, %v1674_v13  ;;  %v601_v55 = vadd.f32 %v1757_v32, %v1677_v26 }
 0x136   :  { %v1759_v24 = vpop.f32.mrf.mxu1  ;;  %v1680_v10 = vadd.f32 %v1679_v23, %v1678_v20 }
 0x137   :  { %v1681_v25 = vpop.f32.mrf.mxu0  ;;  %v932_v19 = vmul.f32 0.001953125, %v596_v22  ;;  %v1760_v61 = vadd.f32 %v1759_v24, %v1758_v21 }
 0x138   :  { %v1761_v28 = vpop.f32.mrf.mxu1 }
 0x139   :  { %v1682_v12 = vpop.f32.mrf.mxu0  ;;  %v2564_v26 = vadd.f32 %v932_v19, %v2404_v7 }
 0x13a   :  { %v1762_v29 = vpop.f32.mrf.mxu1  ;;  %v1683_v32 = vadd.f32 %v1682_v12, %v1681_v25 }
 0x13b   :  { %v2527_v33 = vpop.f32.mrf.mxu0 }
 0x13c   :  { %v2529_v34 = vpop.f32.mrf.mxu1 }
 0x13d   :  { %v2531_v35 = vpop.f32.mrf.mxu0 }
 0x13e   :  { %v2533_v8 = vpop.f32.mrf.mxu1 }
 0x13f   :  { %v2535_v38 = vpop.f32.mrf.mxu0  ;;  %v1766_v7 = vadd.f32 %v2533_v8, %v2529_v34 }
 0x140   :  { %v2537_v39 = vpop.f32.mrf.mxu1 }
 0x141   :  { %v2539_v41 = vpop.f32.mrf.mxu0 }
 0x142   :  { %v2541_v11 = vpop.f32.mrf.mxu1 }
 0x143   :  { %v2543_v42 = vpop.f32.mrf.mxu0  ;;  %v1769_v12 = vadd.f32 %v2541_v11, %v2537_v39 }
 0x144   :  { %v2545_v46 = vpop.f32.mrf.mxu1 }
 0x145   :  { %v2547_v49 = vpop.f32.mrf.mxu0 }
 0x146   :  { %v2549_v50 = vpop.f32.mrf.mxu1 }
 0x147   :  { %v2551_v51 = vpop.f32.mrf.mxu0 }
 0x148   :  { %v2553_v52 = vpop.f32.mrf.mxu1 }
 0x149   :  { %v2555_v56 = vpop.f32.mrf.mxu0 }
 0x14a   :  { %v2557_v63 = vpop.f32.mrf.mxu1 }
 0x14b   :  { %v1808_v44 = vpop.f32.mrf.mxu0 }
 0x14c   :  { %v1888_v30 = vpop.f32.mrf.mxu1 }
 0x14d   :  { %v1809_v18 = vpop.f32.mrf.mxu0 }
 0x14e   :  { %v1889_v58 = vpop.f32.mrf.mxu1  ;;  %v1810_v47 = vadd.f32 %v1809_v18, %v1808_v44 }
 0x14f   :  { %v1890_v36 = vadd.f32 %v1889_v58, %v1888_v30  ;;  %v1811_v37 = vpop.f32.mrf.mxu0 }
 0x150   :  { %v1891_v43 = vpop.f32.mrf.mxu1 }
 0x151   :  { %v846_v48 = vadd.f32 %v1890_v36, %v1810_v47  ;;  %v1812_v54 = vpop.f32.mrf.mxu0  ;;  %v933_v47 = vmul.f32 0.001953125, %v601_v55 }
 0x152   :  { %v1892_v0 = vpop.f32.mrf.mxu1  ;;  %v1813_v1 = vadd.f32 %v1812_v54, %v1811_v37  ;;  %v606_v37 = vadd.f32 %v1760_v61, %v1680_v10 }
 0x153   :  { %v940_v59 = vmul.f32 0.001953125, %v846_v48  ;;  %v1893_v15 = vadd.f32 %v1892_v0, %v1891_v43  ;;  %v1814_v62 = vpop.f32.mrf.mxu0  ;;  %v1763_v43 = vadd.f32 %v1762_v29, %v1761_v28 }
 0x154   :  { %v1894_v2 = vpop.f32.mrf.mxu1  ;;  %v934_v16 = vmul.f32 0.001953125, %v606_v37 }
 0x155   :  { %v851_v27 = vadd.f32 %v1893_v15, %v1813_v1  ;;  %v2560_v58 = vadd.f32 %v940_v59, %v2517_v60  ;;  %v1815_v18 = vpop.f32.mrf.mxu0  ;;  %v1686_v60 = vadd.f32 %v2531_v35, %v2527_v33  ;;  %v611_v13 = vadd.f32 %v1763_v43, %v1683_v32 }
 0x156   :  { %v1895_v30 = vpop.f32.mrf.mxu1  ;;  %v1816_v57 = vadd.f32 %v1815_v18, %v1814_v62  ;;  %v2591_v8 = vadd.f32 %v934_v16, %v2396_v5 }
 0x157   :  { %v941_v44 = vmul.f32 0.001953125, %v851_v27  ;;  %v1896_v36 = vadd.f32 %v1895_v30, %v1894_v2  ;;  %1020 = vmax.xlane.f32.xlu0 %v2560_v58  ;;  %v1817_v0 = vpop.f32.mrf.mxu0  ;;  %v616_v28 = vadd.f32 %v1766_v7, %v1686_v60 }
 0x158   :  { %v1897_v22 = vpop.f32.mrf.mxu1 }
 0x159   :  { %v856_v1 = vadd.f32 %v1896_v36, %v1816_v57  ;;  %v2567_v48 = vadd.f32 %v941_v44, %v2510_v53  ;;  %v1818_v54 = vpop.f32.mrf.mxu0  ;;  %v2576_v53 = vadd.f32 %v933_v47, %v2400_v6  ;;  %v1689_v6 = vadd.f32 %v2539_v41, %v2535_v38 }
 0x15a   :  { %v1898_v59 = vpop.f32.mrf.mxu1  ;;  %v1819_v27 = vadd.f32 %v1818_v54, %v1817_v0  ;;  %v936_v38 = vmul.f32 0.001953125, %v616_v28  ;;  %v1692_v41 = vadd.f32 %v2547_v49, %v2543_v42 }
 0x15b   :  { %v942_v15 = vmul.f32 0.001953125, %v856_v1  ;;  %v1899_v2 = vadd.f32 %v1898_v59, %v1897_v22  ;;  %1022 = vmax.xlane.f32.xlu1 %v2567_v48  ;;  %1004 = vmax.xlane.f32.xlu0 %v2564_v26  ;;  %v1820_v19 = vpop.f32.mrf.mxu0  ;;  %v621_v39 = vadd.f32 %v1769_v12, %v1689_v6  ;;  %v2773_v1 = vld [vmem:[#allocation29_spill] sm:$0xff]  ;;  %v2776_v12 = vld [vmem:[#allocation26_spill] sm:$0xff] }
 0x15c   :  { %v1900_v14 = vpop.f32.mrf.mxu1  ;;  %v2608_v32 = vadd.f32 %v936_v38, %v2388_v3 }
 0x15d   :  { %v861_v9 = vadd.f32 %v1899_v2, %v1819_v27  ;;  %v2579_v17 = vadd.f32 %v942_v15, %v2505_v45  ;;  %v1821_v20 = vpop.f32.mrf.mxu0  ;;  %v935_v45 = vmul.f32 0.001953125, %v611_v13  ;;  %v937_v42 = vmul.f32 0.001953125, %v621_v39 }
 0x15e   :  { %v1901_v21 = vpop.f32.mrf.mxu1  ;;  %v1822_v24 = vadd.f32 %v1821_v20, %v1820_v19  ;;  %v2774_v19 = vld [vmem:[#allocation14_spill] sm:$0xff] }
 0x15f   :  { %v943_v23 = vmul.f32 0.001953125, %v861_v9  ;;  %v1902_v25 = vadd.f32 %v1901_v21, %v1900_v14  ;;  %1024 = vmax.xlane.f32.xlu1 %v2579_v17  ;;  %1006 = vmax.xlane.f32.xlu0 %v2576_v53  ;;  %v1823_v29 = vpop.f32.mrf.mxu0  ;;  %v2603_v57 = vadd.f32 %v935_v45, %v2392_v4  ;;  %v1695_v4 = vadd.f32 %v2555_v56, %v2551_v51  ;;  %v2775_v14 = vld [vmem:[#allocation28_spill] sm:$0xff] }
 0x160   :  { %v1903_v33 = vpop.f32.mrf.mxu1  ;;  %v2620_v51 = vadd.f32 %v937_v42, %v2774_v19 }
 0x161   :  { %v866_v34 = vadd.f32 %v1902_v25, %v1822_v24  ;;  %v2588_v35 = vadd.f32 %v943_v23, %v2498_v40  ;;  %v1824_v55 = vpop.f32.mrf.mxu0  ;;  %v1772_v40 = vadd.f32 %v2549_v50, %v2545_v46 }
 0x162   :  { %v1904_v10 = vpop.f32.mrf.mxu1  ;;  %v1825_v62 = vadd.f32 %v1824_v55, %v1823_v29 }
 0x163   :  { %v944_v61 = vmul.f32 0.001953125, %v866_v34  ;;  %v1905_v18 = vadd.f32 %v1904_v10, %v1903_v33  ;;  %1026 = vmax.xlane.f32.xlu1 %v2588_v35  ;;  %1008 = vmax.xlane.f32.xlu0 %v2591_v8  ;;  %v1826_v11 = vpop.f32.mrf.mxu0  ;;  %v626_v46 = vadd.f32 %v1772_v40, %v1692_v41  ;;  %v2777_v33 = vld [vmem:[#allocation13_spill] sm:$0xff] }
 0x164   :  { %v1906_v5 = vpop.f32.mrf.mxu1  ;;  %v2778_v41 = vld [vmem:[#allocation25_spill] sm:$0xff] }
 0x165   :  { %v871_v30 = vadd.f32 %v1905_v18, %v1825_v62  ;;  %v2600_v44 = vadd.f32 %v944_v61, %v2493_v31  ;;  %v1827_v36 = vpop.f32.mrf.mxu0  ;;  %v1775_v31 = vadd.f32 %v2557_v63, %v2553_v52  ;;  %v938_v56 = vmul.f32 0.001953125, %v626_v46 }
 0x166   :  { %v1907_v47 = vpop.f32.mrf.mxu1  ;;  %v1828_v0 = vadd.f32 %v1827_v36, %v1826_v11  ;;  %v2779_v11 = vld [vmem:[#allocation12_spill] sm:$0xff] }
 0x167   :  { %v945_v37 = vmul.f32 0.001953125, %v871_v30  ;;  %v1908_v22 = vadd.f32 %v1907_v47, %v1906_v5  ;;  %1028 = vmax.xlane.f32.xlu1 %v2600_v44  ;;  %1010 = vmax.xlane.f32.xlu0 %v2603_v57  ;;  %v1829_v49 = vpop.f32.mrf.mxu0  ;;  %v631_v52 = vadd.f32 %v1775_v31, %v1695_v4  ;;  %v2631_v45 = vadd.f32 %v938_v56, %v2777_v33 }
 0x168   :  { %v1909_v50 = vpop.f32.mrf.mxu1 }
 0x169   :  { %v876_v43 = vadd.f32 %v1908_v22, %v1828_v0  ;;  %v2615_v54 = vadd.f32 %v945_v37, %v2773_v1  ;;  %v1830_v59 = vpop.f32.mrf.mxu0  ;;  %v939_v28 = vmul.f32 0.001953125, %v631_v52 }
 0x16a   :  { %v1910_v15 = vpop.f32.mrf.mxu1  ;;  %v1831_v2 = vadd.f32 %v1830_v59, %v1829_v49  ;;  %v2780_v49 = vld [vmem:[#allocation23_spill] sm:$0xff] }
 0x16b   :  { %v946_v27 = vmul.f32 0.001953125, %v876_v43  ;;  %v1911_v60 = vadd.f32 %v1910_v15, %v1909_v50  ;;  %1030 = vmax.xlane.f32.xlu1 %v2615_v54  ;;  %1012 = vmax.xlane.f32.xlu0 %v2608_v32  ;;  %v1832_v3 = vpop.f32.mrf.mxu0  ;;  %v2639_v5 = vadd.f32 %v939_v28, %v2779_v11 }
 0x16c   :  { %v1912_v7 = vpop.f32.mrf.mxu1 }
 0x16d   :  { %v881_v63 = vadd.f32 %v1911_v60, %v1831_v2  ;;  %v2623_v16 = vadd.f32 %v946_v27, %v2775_v14  ;;  %v1833_v13 = vpop.f32.mrf.mxu0  ;;  %v2781_v60 = vld [vmem:[#allocation22_spill] sm:$0xff] }
 0x16e   :  { %v1913_v9 = vpop.f32.mrf.mxu1  ;;  %v1834_v21 = vadd.f32 %v1833_v13, %v1832_v3 }
 0x16f   :  { %v947_v20 = vmul.f32 0.001953125, %v881_v63  ;;  %v1914_v23 = vadd.f32 %v1913_v9, %v1912_v7  ;;  %1032 = vmax.xlane.f32.xlu1 %v2623_v16  ;;  %1014 = vmax.xlane.f32.xlu0 %v2620_v51  ;;  %v1835_v24 = vpop.f32.mrf.mxu0 }
 0x170   :  { %v1915_v25 = vpop.f32.mrf.mxu1 }
 0x171   :  { %v886_v6 = vadd.f32 %v1914_v23, %v1834_v21  ;;  %v2628_v29 = vadd.f32 %v947_v20, %v2776_v12  ;;  %v1836_v34 = vpop.f32.mrf.mxu0  ;;  %v2782_v20 = vld [vmem:[#allocation20_spill] sm:$0xff] }
 0x172   :  { %v1916_v55 = vpop.f32.mrf.mxu1  ;;  %v1837_v61 = vadd.f32 %v1836_v34, %v1835_v24 }
 0x173   :  { %v948_v10 = vmul.f32 0.001953125, %v886_v6  ;;  %v1917_v62 = vadd.f32 %v1916_v55, %v1915_v25  ;;  %1034 = vmax.xlane.f32.xlu1 %v2628_v29  ;;  %1016 = vmax.xlane.f32.xlu0 %v2631_v45  ;;  %v1838_v18 = vpop.f32.mrf.mxu0  ;;  %v2783_v55 = vld [vmem:[#allocation19_spill] sm:$0xff] }
 0x174   :  { %v1918_v38 = vpop.f32.mrf.mxu1 }
 0x175   :  { %v891_v39 = vadd.f32 %v1917_v62, %v1837_v61  ;;  %v2636_v40 = vadd.f32 %v948_v10, %v2778_v41  ;;  %v1839_v30 = vpop.f32.mrf.mxu0 }
 0x176   :  { %v1919_v36 = vpop.f32.mrf.mxu1  ;;  %v1840_v37 = vadd.f32 %v1839_v30, %v1838_v18 }
 0x177   :  { %v949_v47 = vmul.f32 0.001953125, %v891_v39  ;;  %v1920_v0 = vadd.f32 %v1919_v36, %v1918_v38  ;;  %1036 = vmax.xlane.f32.xlu1 %v2636_v40  ;;  %1018 = vmax.xlane.f32.xlu0 %v2639_v5  ;;  %v1841_v22 = vpop.f32.mrf.mxu0  ;;  %v2784_v36 = vld [vmem:[#allocation17_spill] sm:$0xff] }
 0x178   :  { %v1921_v42 = vpop.f32.mrf.mxu1 }
 0x179   :  { %v896_v46 = vadd.f32 %v1920_v0, %v1840_v37  ;;  %v2644_v50 = vadd.f32 %v949_v47, %v2780_v49  ;;  %v1842_v4 = vpop.f32.mrf.mxu0 }
 0x17a   :  { %v1922_v31 = vpop.f32.mrf.mxu1  ;;  %v1843_v1 = vadd.f32 %v1842_v4, %v1841_v22  ;;  %v2785_v4 = vld [vmem:[#allocation16_spill] sm:$0xff] }
 0x17b   :  { %v950_v43 = vmul.f32 0.001953125, %v896_v46  ;;  %v1923_v59 = vadd.f32 %v1922_v31, %v1921_v42  ;;  %1038 = vmax.xlane.f32.xlu1 %v2644_v50  ;;  %v1844_v15 = vpop.f32.mrf.mxu0 }
 0x17c   :  { %v1924_v27 = vpop.f32.mrf.mxu1 }
 0x17d   :  { %v901_v2 = vadd.f32 %v1923_v59, %v1843_v1  ;;  %v2648_v3 = vadd.f32 %v950_v43, %v2781_v60  ;;  %v1845_v7 = vpop.f32.mrf.mxu0  ;;  %v2786_v1 = vld [vmem:[#allocation15_spill] sm:$0xff] }
 0x17e   :  { %v1925_v19 = vpop.f32.mrf.mxu1  ;;  %v1846_v52 = vadd.f32 %v1845_v7, %v1844_v15 }
 0x17f   :  { %v951_v56 = vmul.f32 0.001953125, %v901_v2  ;;  %v1926_v63 = vadd.f32 %v1925_v19, %v1924_v27  ;;  %1040 = vmax.xlane.f32.xlu1 %v2648_v3  ;;  %v1847_v14 = vpop.f32.mrf.mxu0  ;;  %v2787_v27 = vld [vmem:[#allocation18_spill] sm:$0xff]  ;;  %v2788_v19 = vld [vmem:[#allocation21_spill] sm:$0xff] }
 0x180   :  { %v1927_v13 = vpop.f32.mrf.mxu1 }
 0x181   :  { %v906_v9 = vadd.f32 %v1926_v63, %v1846_v52  ;;  %v2652_v21 = vadd.f32 %v951_v56, %v2782_v20  ;;  %v1848_v23 = vpop.f32.mrf.mxu0 }
 0x182   :  { %v1928_v24 = vpop.f32.mrf.mxu1  ;;  %v1849_v28 = vadd.f32 %v1848_v23, %v1847_v14  ;;  %v2789_v14 = vld [vmem:[#allocation24_spill] sm:$0xff]  ;;  %v2790_v23 = vld [vmem:[#allocation27_spill] sm:$0xff] }
 0x183   :  { %v952_v25 = vmul.f32 0.001953125, %v906_v9  ;;  %v1929_v6 = vadd.f32 %v1928_v24, %v1927_v13  ;;  %1042 = vmax.xlane.f32.xlu1 %v2652_v21  ;;  %v1850_v12 = vpop.f32.mrf.mxu0 }
 0x184   :  { %v1930_v33 = vpop.f32.mrf.mxu1 }
 0x185   :  { %v911_v34 = vadd.f32 %v1929_v6, %v1849_v28  ;;  %v2656_v10 = vadd.f32 %v952_v25, %v2783_v55  ;;  %v1851_v61 = vpop.f32.mrf.mxu0  ;;  %v2791_v6 = vld [vmem:[#allocation30_spill] sm:$0xff] }
 0x186   :  { %v1931_v62 = vpop.f32.mrf.mxu1  ;;  %v1852_v38 = vadd.f32 %v1851_v61, %v1850_v12  ;;  %v2792_v61 = vld [vmem:[#allocation31_spill] sm:$0xff] }
 0x187   :  { %v953_v18 = vmul.f32 0.001953125, %v911_v34  ;;  %v1932_v39 = vadd.f32 %v1931_v62, %v1930_v33  ;;  %1044 = vmax.xlane.f32.xlu1 %v2656_v10  ;;  %v1853_v41 = vpop.f32.mrf.mxu0 }
 0x188   :  { %v1933_v11 = vpop.f32.mrf.mxu1 }
 0x189   :  { %v916_v30 = vadd.f32 %v1932_v39, %v1852_v38  ;;  %v2660_v47 = vadd.f32 %v953_v18, %v2784_v36  ;;  %v1854_v37 = vpop.f32.mrf.mxu0 }
 0x18a   :  { %v1934_v0 = vpop.f32.mrf.mxu1  ;;  %v1855_v42 = vadd.f32 %v1854_v37, %v1853_v41  ;;  %v2793_v41 = vld [vmem:[#allocation32_spill] sm:$0xff] }
 0x18b   :  { %v954_v22 = vmul.f32 0.001953125, %v916_v30  ;;  %v1935_v46 = vadd.f32 %v1934_v0, %v1933_v11  ;;  %1046 = vmax.xlane.f32.xlu1 %v2660_v47  ;;  %v2794_v0 = vld [vmem:[#allocation33_spill] sm:$0xff] }
 0x18d   :  { %v921_v49 = vadd.f32 %v1935_v46, %v1855_v42  ;;  %v2664_v31 = vadd.f32 %v954_v22, %v2785_v4 }
 0x18f   :  { %v955_v43 = vmul.f32 0.001953125, %v921_v49  ;;  %1048 = vmax.xlane.f32.xlu1 %v2664_v31 }
 0x191   :  { %v2668_v59 = vadd.f32 %v955_v43, %v2786_v1 }
 0x193   :  { %1050 = vmax.xlane.f32.xlu1 %v2668_v59 }
 0x1a0   :  { %v989_v15 = vpop.xlane.xlu0 %988 }
 0x1a1   :  { %v1052_v2 = vsub.f32 %v2787_v27, %v989_v15 }
 0x1a3   :  { %v1084_v60 = vmul.f32 1.442695, %v1052_v2 }
 0x1a4   :  { %v991_v7 = vpop.xlane.xlu1 %990 }
 0x1a5   :  { %2120 = vpow2.f32 %v1084_v60  ;;  %v1053_v56 = vsub.f32 %v2788_v19, %v991_v7 }
 0x1a7   :  { %v1086_v52 = vmul.f32 1.442695, %v1053_v56 }
 0x1a8   :  { %v993_v63 = vpop.xlane.xlu0 %992 }
 0x1a9   :  { %2122 = vpow2.f32 %v1086_v52  ;;  %v1054_v13 = vsub.f32 %v2789_v14, %v993_v63 }
 0x1ab   :  { %v1088_v9 = vmul.f32 1.442695, %v1054_v13 }
 0x1ac   :  { %v995_v20 = vpop.xlane.xlu0 %994 }
 0x1ad   :  { %2124 = vpow2.f32 %v1088_v9  ;;  %v1055_v24 = vsub.f32 %v2790_v23, %v995_v20 }
 0x1af   :  { %v1090_v25 = vmul.f32 1.442695, %v1055_v24 }
 0x1b0   :  { %v997_v28 = vpop.xlane.xlu0 %996 }
 0x1b1   :  { %2126 = vpow2.f32 %v1090_v25  ;;  %v1056_v12 = vsub.f32 %v2791_v6, %v997_v28 }
 0x1b2   :  { %v2121_v33 = vpop.eup %2120 }
 0x1b3   :  { %v1092_v34 = vmul.f32 1.442695, %v1056_v12  ;;  %1148 = vadd.xlane.f32.xlu0 %v2121_v33  ;;  %2032 = vmatprep.mubr.f32.mxu0 %v2121_v33 }
 0x1b4   :  { %v999_v55 = vpop.xlane.xlu0 %998 }
 0x1b5   :  { %2128 = vpow2.f32 %v1092_v34  ;;  %v1057_v62 = vsub.f32 %v2792_v61, %v999_v55 }
 0x1b6   :  { %v2123_v18 = vpop.eup %2122 }
 0x1b7   :  { %v1094_v38 = vmul.f32 1.442695, %v1057_v62  ;;  %1150 = vadd.xlane.f32.xlu1 %v2123_v18  ;;  %2033 = vmatmul.mubr.f32.vlgmr.msra.gmra.mxu0 %v2123_v18 }
 0x1b8   :  { %v1001_v39 = vpop.xlane.xlu0 %1000 }
 0x1b9   :  { %2130 = vpow2.f32 %v1094_v38  ;;  %v1058_v11 = vsub.f32 %v2793_v41, %v1001_v39 }
 0x1ba   :  { %v2125_v30 = vpop.eup %2124 }
 0x1bb   :  { %v1096_v36 = vmul.f32 1.442695, %v1058_v11  ;;  %1152 = vadd.xlane.f32.xlu0 %v2125_v30  ;;  %2035 = vmatprep.mubr.f32.mxu0 %v2125_v30 }
 0x1bc   :  { %v1003_v37 = vpop.xlane.xlu0 %1002 }
 0x1bd   :  { %2132 = vpow2.f32 %v1096_v36  ;;  %v1059_v22 = vsub.f32 %v2794_v0, %v1003_v37 }
 0x1be   :  { %v2127_v42 = vpop.eup %2126 }
 0x1bf   :  { %v1098_v46 = vmul.f32 1.442695, %v1059_v22  ;;  %1154 = vadd.xlane.f32.xlu1 %v2127_v42  ;;  %2036 = vmatmul.mubr.f32.gmra.mxu0 %v2127_v42 }
 0x1c1   :  { %2134 = vpow2.f32 %v1098_v46 }
 0x1c2   :  { %v2129_v49 = vpop.eup %2128 }
 0x1c3   :  { %1156 = vadd.xlane.f32.xlu0 %v2129_v49  ;;  %2038 = vmatprep.mubr.f32.mxu0 %v2129_v49 }
 0x1c6   :  { %v2131_v4 = vpop.eup %2130 }
 0x1c7   :  { %1158 = vadd.xlane.f32.xlu1 %v2131_v4  ;;  %2039 = vmatmul.mubr.f32.gmra.mxu0 %v2131_v4 }
 0x1ca   :  { %v2133_v43 = vpop.eup %2132 }
 0x1cb   :  { %1160 = vadd.xlane.f32.xlu0 %v2133_v43  ;;  %2041 = vmatprep.mubr.f32.mxu0 %v2133_v43 }
 0x1ce   :  { %v2135_v1 = vpop.eup %2134 }
 0x1cf   :  { %1162 = vadd.xlane.f32.xlu1 %v2135_v1  ;;  %2042 = vmatmul.mubr.f32.gmra.mxu0 %v2135_v1 }
 0x1e0   :  { %v1021_v15 = vpop.xlane.xlu0 %1020 }
 0x1e1   :  { %v1068_v27 = vsub.f32 %v2560_v58, %v1021_v15 }
 0x1e3   :  { %v1116_v2 = vmul.f32 1.442695, %v1068_v27 }
 0x1e4   :  { %v1023_v60 = vpop.xlane.xlu1 %1022  ;;  %v1005_v7 = vpop.xlane.xlu0 %1004 }
 0x1e5   :  { %2136 = vpow2.f32 %v1116_v2  ;;  %v1069_v19 = vsub.f32 %v2567_v48, %v1023_v60  ;;  %v1060_v56 = vsub.f32 %v2564_v26, %v1005_v7 }
 0x1e7   :  { %v1118_v52 = vmul.f32 1.442695, %v1069_v19  ;;  %v1100_v63 = vmul.f32 1.442695, %v1060_v56 }
 0x1e8   :  { %v1025_v14 = vpop.xlane.xlu1 %1024  ;;  %v1007_v13 = vpop.xlane.xlu0 %1006 }
 0x1e9   :  { %2138 = vpow2.f32 %v1118_v52  ;;  %v1070_v9 = vsub.f32 %v2579_v17, %v1025_v14  ;;  %v1061_v20 = vsub.f32 %v2576_v53, %v1007_v13 }
 0x1ea   :  { %2140 = vpow2.f32 %v1100_v63 }
 0x1eb   :  { %v1120_v23 = vmul.f32 1.442695, %v1070_v9  ;;  %v1102_v58 = vmul.f32 1.442695, %v1061_v20 }
 0x1ec   :  { %v1027_v24 = vpop.xlane.xlu1 %1026  ;;  %v1009_v25 = vpop.xlane.xlu0 %1008 }
 0x1ed   :  { %2142 = vpow2.f32 %v1120_v23  ;;  %v1071_v28 = vsub.f32 %v2588_v35, %v1027_v24  ;;  %v1062_v48 = vsub.f32 %v2591_v8, %v1009_v25 }
 0x1ee   :  { %2144 = vpow2.f32 %v1102_v58 }
 0x1ef   :  { %v1122_v26 = vmul.f32 1.442695, %v1071_v28  ;;  %v1104_v6 = vmul.f32 1.442695, %v1062_v48 }
 0x1f0   :  { %v1029_v12 = vpop.xlane.xlu1 %1028  ;;  %v1011_v33 = vpop.xlane.xlu0 %1010 }
 0x1f1   :  { %2146 = vpow2.f32 %v1122_v26  ;;  %v1072_v17 = vsub.f32 %v2600_v44, %v1029_v12  ;;  %v1063_v53 = vsub.f32 %v2603_v57, %v1011_v33 }
 0x1f2   :  { %v2688_v34 = vpop.eup %2136  ;;  %2148 = vpow2.f32 %v1104_v6 }
 0x1f3   :  { %v1124_v55 = vmul.f32 1.442695, %v1072_v17  ;;  %v1106_v61 = vmul.f32 1.442695, %v1063_v53  ;;  %2088 = vmatprep.mubr.f32.mxu1 %v2688_v34 }
 0x1f4   :  { %v1031_v35 = vpop.xlane.xlu1 %1030  ;;  %v1013_v62 = vpop.xlane.xlu0 %1012 }
 0x1f5   :  { %2150 = vpow2.f32 %v1124_v55  ;;  %v1073_v8 = vsub.f32 %v2615_v54, %v1031_v35  ;;  %v1064_v18 = vsub.f32 %v2608_v32, %v1013_v62 }
 0x1f6   :  { %v2693_v38 = vpop.eup %2138  ;;  %2152 = vpow2.f32 %v1106_v61 }
 0x1f7   :  { %v2141_v44 = vpop.eup %2140  ;;  %v1126_v39 = vmul.f32 1.442695, %v1073_v8  ;;  %v1108_v57 = vmul.f32 1.442695, %v1064_v18  ;;  %2089 = vmatmul.mubr.f32.vlgmr.msra.gmra.mxu1 %v2693_v38 }
 0x1f8   :  { %1164 = vadd.xlane.f32.xlu0 %v2141_v44  ;;  %2044 = vmatprep.mubr.f32.mxu0 %v2141_v44  ;;  %v1033_v41 = vpop.xlane.xlu1 %1032  ;;  %v1015_v11 = vpop.xlane.xlu0 %1014 }
 0x1f9   :  { %2154 = vpow2.f32 %v1126_v39  ;;  %v1074_v30 = vsub.f32 %v2623_v16, %v1033_v41  ;;  %v1065_v36 = vsub.f32 %v2620_v51, %v1015_v11 }
 0x1fa   :  { %v2698_v54 = vpop.eup %2142  ;;  %2156 = vpow2.f32 %v1108_v57 }
 0x1fb   :  { %v2145_v32 = vpop.eup %2144  ;;  %v1128_v37 = vmul.f32 1.442695, %v1074_v30  ;;  %v1110_v0 = vmul.f32 1.442695, %v1065_v36  ;;  %2091 = vmatprep.mubr.f32.mxu1 %v2698_v54 }
 0x1fc   :  { %1166 = vadd.xlane.f32.xlu1 %v2145_v32  ;;  %2045 = vmatmul.mubr.f32.gmra.mxu0 %v2145_v32  ;;  %v1035_v22 = vpop.xlane.xlu1 %1034  ;;  %v1017_v42 = vpop.xlane.xlu0 %1016 }
 0x1fd   :  { %2158 = vpow2.f32 %v1128_v37  ;;  %v1075_v46 = vsub.f32 %v2628_v29, %v1035_v22  ;;  %v1066_v49 = vsub.f32 %v2631_v45, %v1017_v42 }
 0x1fe   :  { %v2703_v16 = vpop.eup %2146  ;;  %2160 = vpow2.f32 %v1110_v0 }
 0x1ff   :  { %v2149_v51 = vpop.eup %2148  ;;  %v1130_v4 = vmul.f32 1.442695, %v1075_v46  ;;  %v1112_v43 = vmul.f32 1.442695, %v1066_v49  ;;  %2092 = vmatmul.mubr.f32.gmra.mxu1 %v2703_v16 }
 0x200   :  { %1168 = vadd.xlane.f32.xlu0 %v2149_v51  ;;  %2047 = vmatprep.mubr.f32.mxu0 %v2149_v51  ;;  %v1037_v1 = vpop.xlane.xlu1 %1036  ;;  %v1019_v15 = vpop.xlane.xlu0 %1018 }
 0x201   :  { %2162 = vpow2.f32 %v1130_v4  ;;  %v1076_v27 = vsub.f32 %v2636_v40, %v1037_v1  ;;  %v1067_v2 = vsub.f32 %v2639_v5, %v1019_v15 }
 0x202   :  { %v2151_v29 = vpop.eup %2150  ;;  %2164 = vpow2.f32 %v1112_v43 }
 0x203   :  { %v2153_v45 = vpop.eup %2152  ;;  %v1132_v60 = vmul.f32 1.442695, %v1076_v27  ;;  %v1114_v7 = vmul.f32 1.442695, %v1067_v2  ;;  %2094 = vmatprep.mubr.f32.mxu1 %v2151_v29 }
 0x204   :  { %1170 = vadd.xlane.f32.xlu1 %v2153_v45  ;;  %2048 = vmatmul.mubr.f32.gmra.mxu0 %v2153_v45  ;;  %v1039_v19 = vpop.xlane.xlu1 %1038 }
 0x205   :  { %2166 = vpow2.f32 %v1132_v60  ;;  %v1077_v56 = vsub.f32 %v2644_v50, %v1039_v19 }
 0x206   :  { %v2155_v52 = vpop.eup %2154  ;;  %2168 = vpow2.f32 %v1114_v7 }
 0x207   :  { %v2157_v63 = vpop.eup %2156  ;;  %v1134_v14 = vmul.f32 1.442695, %v1077_v56  ;;  %2095 = vmatmul.mubr.f32.gmra.mxu1 %v2155_v52 }
 0x208   :  { %1172 = vadd.xlane.f32.xlu0 %v2157_v63  ;;  %2050 = vmatprep.mubr.f32.mxu0 %v2157_v63  ;;  %v1041_v40 = vpop.xlane.xlu1 %1040 }
 0x209   :  { %2170 = vpow2.f32 %v1134_v14  ;;  %v1078_v5 = vsub.f32 %v2648_v3, %v1041_v40 }
 0x20a   :  { %v2159_v13 = vpop.eup %2158 }
 0x20b   :  { %v2161_v9 = vpop.eup %2160  ;;  %v1136_v20 = vmul.f32 1.442695, %v1078_v5  ;;  %2097 = vmatprep.mubr.f32.mxu1 %v2159_v13 }
 0x20c   :  { %1174 = vadd.xlane.f32.xlu1 %v2161_v9  ;;  %2051 = vmatmul.mubr.f32.gmra.mxu0 %v2161_v9  ;;  %v1043_v23 = vpop.xlane.xlu1 %1042 }
 0x20d   :  { %2172 = vpow2.f32 %v1136_v20  ;;  %v1079_v50 = vsub.f32 %v2652_v21, %v1043_v23 }
 0x20e   :  { %v2163_v58 = vpop.eup %2162 }
 0x20f   :  { %v2165_v24 = vpop.eup %2164  ;;  %v1138_v25 = vmul.f32 1.442695, %v1079_v50  ;;  %2098 = vmatmul.mubr.f32.gmra.mxu1 %v2163_v58 }
 0x210   :  { %1176 = vadd.xlane.f32.xlu0 %v2165_v24  ;;  %2053 = vmatprep.mubr.f32.mxu0 %v2165_v24  ;;  %v1045_v28 = vpop.xlane.xlu1 %1044 }
 0x211   :  { %2174 = vpow2.f32 %v1138_v25  ;;  %v1080_v3 = vsub.f32 %v2656_v10, %v1045_v28 }
 0x212   :  { %v2167_v48 = vpop.eup %2166 }
 0x213   :  { %v2169_v26 = vpop.eup %2168  ;;  %v1140_v6 = vmul.f32 1.442695, %v1080_v3  ;;  %2100 = vmatprep.mubr.f32.mxu1 %v2167_v48 }
 0x214   :  { %1180 = vadd.xlane.f32.xlu0 %v2688_v34  ;;  %1178 = vadd.xlane.f32.xlu1 %v2169_v26  ;;  %v1047_v12 = vpop.xlane.xlu1 %1046 }
 0x215   :  { %2176 = vpow2.f32 %v1140_v6  ;;  %2054 = vmatmul.mubr.f32.gmra.mxu0 %v2169_v26  ;;  %v1081_v21 = vsub.f32 %v2660_v47, %v1047_v12 }
 0x216   :  { %v2171_v33 = vpop.eup %2170 }
 0x217   :  { %v1142_v17 = vmul.f32 1.442695, %v1081_v21  ;;  %2101 = vmatmul.mubr.f32.gmra.mxu1 %v2171_v33 }
 0x218   :  { %1184 = vadd.xlane.f32.xlu0 %v2698_v54  ;;  %1182 = vadd.xlane.f32.xlu1 %v2693_v38  ;;  %v1049_v10 = vpop.xlane.xlu1 %1048 }
 0x219   :  { %2178 = vpow2.f32 %v1142_v17  ;;  %v1082_v53 = vsub.f32 %v2664_v31, %v1049_v10 }
 0x21a   :  { %v2173_v55 = vpop.eup %2172 }
 0x21b   :  { %v1144_v61 = vmul.f32 1.442695, %v1082_v53  ;;  %2103 = vmatprep.mubr.f32.mxu1 %v2173_v55 }
 0x21c   :  { %1188 = vadd.xlane.f32.xlu0 %v2151_v29  ;;  %1186 = vadd.xlane.f32.xlu1 %v2703_v16  ;;  %v1051_v34 = vpop.xlane.xlu1 %1050 }
 0x21d   :  { %2180 = vpow2.f32 %v1144_v61  ;;  %v1083_v47 = vsub.f32 %v2668_v59, %v1051_v34 }
 0x21e   :  { %v2175_v35 = vpop.eup %2174 }
 0x21f   :  { %v1146_v62 = vmul.f32 1.442695, %v1083_v47  ;;  %2104 = vmatmul.mubr.f32.gmra.mxu1 %v2175_v35 }
 0x220   :  { %1192 = vadd.xlane.f32.xlu0 %v2159_v13  ;;  %1190 = vadd.xlane.f32.xlu1 %v2155_v52 }
 0x221   :  { %2182 = vpow2.f32 %v1146_v62 }
 0x222   :  { %v2177_v8 = vpop.eup %2176 }
 0x223   :  { %2106 = vmatprep.mubr.f32.mxu1 %v2177_v8 }
 0x224   :  { %1196 = vadd.xlane.f32.xlu0 %v2167_v48  ;;  %1194 = vadd.xlane.f32.xlu1 %v2163_v58 }
 0x226   :  { %v2179_v31 = vpop.eup %2178 }
 0x227   :  { %2107 = vmatmul.mubr.f32.gmra.mxu1 %v2179_v31 }
 0x228   :  { %1200 = vadd.xlane.f32.xlu0 %v2173_v55  ;;  %1198 = vadd.xlane.f32.xlu1 %v2171_v33 }
 0x22a   :  { %v2181_v18 = vpop.eup %2180 }
 0x22b   :  { %2109 = vmatprep.mubr.f32.mxu1 %v2181_v18 }
 0x22c   :  { %1204 = vadd.xlane.f32.xlu0 %v2177_v8  ;;  %1202 = vadd.xlane.f32.xlu1 %v2175_v35 }
 0x22e   :  { %v2183_v38 = vpop.eup %2182 }
 0x22f   :  { %2110 = vmatmul.mubr.f32.gmra.mxu1 %v2183_v38 }
 0x230   :  { %1208 = vadd.xlane.f32.xlu0 %v2181_v18  ;;  %1206 = vadd.xlane.f32.xlu1 %v2179_v31 }
 0x234   :  { %1210 = vadd.xlane.f32.xlu1 %v2183_v38 }
 0x23c   :  { %v1149_v44 = vpop.xlane.xlu0 %1148 }
 0x240   :  { %v1151_v59 = vpop.xlane.xlu1 %1150 }
 0x241   :  { %2184 = vrcp.f32 %v1151_v59 }
 0x242   :  { %2186 = vrcp.f32 %v1149_v44 }
 0x244   :  { %v1153_v57 = vpop.xlane.xlu0 %1152 }
 0x248   :  { %v1155_v39 = vpop.xlane.xlu1 %1154 }
 0x249   :  { %2188 = vrcp.f32 %v1155_v39 }
 0x24a   :  { %2190 = vrcp.f32 %v1153_v57 }
 0x24c   :  { %v1157_v32 = vpop.xlane.xlu0 %1156 }
 0x24e   :  { %v2185_v41 = vpop.eup %2184 }
 0x24f   :  { %v2187_v54 = vpop.eup %2186 }
 0x250   :  { %v1159_v11 = vpop.xlane.xlu1 %1158 }
 0x251   :  { %2192 = vrcp.f32 %v1159_v11 }
 0x252   :  { %2194 = vrcp.f32 %v1157_v32 }
 0x254   :  { %v1161_v51 = vpop.xlane.xlu0 %1160 }
 0x256   :  { %v2189_v22 = vpop.eup %2188 }
 0x257   :  { %v2191_v16 = vpop.eup %2190 }
 0x258   :  { %v1163_v42 = vpop.xlane.xlu1 %1162 }
 0x259   :  { %2196 = vrcp.f32 %v1163_v42 }
 0x25a   :  { %2198 = vrcp.f32 %v1161_v51 }
 0x25e   :  { %v2193_v1 = vpop.eup %2192 }
 0x25f   :  { %v2195_v2 = vpop.eup %2194 }
 0x266   :  { %v2197_v60 = vpop.eup %2196 }
 0x267   :  { %v2199_v56 = vpop.eup %2198 }
 0x277   :  { %v2034_v30 = vpop.f32.mrf.mxu0 }
 0x278   :  { %v1535_v36 = vmul.f32 %v2185_v41, %v2034_v30 }
 0x279   :  { %v1278_v37 = vpop.f32.mrf.mxu0 }
 0x27a   :  { %1567 = vst [vmem:[#allocation8 + $0x8] sm:$0xff] %v1535_v36  ;;  %v1534_v0 = vmul.f32 %v2187_v54, %v1278_v37 }
 0x27c   :  { %1566 = vst [vmem:[#allocation8] sm:$0xff] %v1534_v0 }
 0x27f   :  { %v2037_v46 = vpop.f32.mrf.mxu0 }
 0x280   :  { %v1537_v49 = vmul.f32 %v2189_v22, %v2037_v46 }
 0x281   :  { %v1288_v4 = vpop.f32.mrf.mxu0  ;;  %v1165_v40 = vpop.xlane.xlu0 %1164 }
 0x282   :  { %1569 = vst [vmem:[#allocation8 + $0x18] sm:$0xff] %v1537_v49  ;;  %v1536_v43 = vmul.f32 %v2191_v16, %v1288_v4 }
 0x284   :  { %1568 = vst [vmem:[#allocation8 + $0x10] sm:$0xff] %v1536_v43 }
 0x285   :  { %v1167_v14 = vpop.xlane.xlu1 %1166 }
 0x287   :  { %v2040_v15 = vpop.f32.mrf.mxu0 }
 0x288   :  { %v1539_v27 = vmul.f32 %v2193_v1, %v2040_v15 }
 0x289   :  { %v1298_v29 = vpop.f32.mrf.mxu0  ;;  %v1169_v13 = vpop.xlane.xlu0 %1168 }
 0x28a   :  { %1571 = vst [vmem:[#allocation8 + $0x28] sm:$0xff] %v1539_v27  ;;  %v1538_v45 = vmul.f32 %v2195_v2, %v1298_v29 }
 0x28c   :  { %1570 = vst [vmem:[#allocation8 + $0x20] sm:$0xff] %v1538_v45 }
 0x28d   :  { %v1171_v5 = vpop.xlane.xlu1 %1170 }
 0x28f   :  { %v2043_v7 = vpop.f32.mrf.mxu0 }
 0x290   :  { %v1541_v19 = vmul.f32 %v2197_v60, %v2043_v7 }
 0x291   :  { %v1308_v52 = vpop.f32.mrf.mxu0  ;;  %v1173_v20 = vpop.xlane.xlu0 %1172 }
 0x292   :  { %1573 = vst [vmem:[#allocation8 + $0x38] sm:$0xff] %v1541_v19  ;;  %v1540_v63 = vmul.f32 %v2199_v56, %v1308_v52 }
 0x294   :  { %1572 = vst [vmem:[#allocation8 + $0x30] sm:$0xff] %v1540_v63 }
 0x295   :  { %v1175_v9 = vpop.xlane.xlu1 %1174 }
 0x299   :  { %v1177_v50 = vpop.xlane.xlu0 %1176 }
 0x29d   :  { %v1179_v23 = vpop.xlane.xlu1 %1178  ;;  %v1181_v24 = vpop.xlane.xlu0 %1180 }
 0x2a1   :  { %v1183_v58 = vpop.xlane.xlu1 %1182  ;;  %v1185_v28 = vpop.xlane.xlu0 %1184 }
 0x2a2   :  { %2200 = vrcp.f32 %v1183_v58 }
 0x2a3   :  { %2202 = vrcp.f32 %v1181_v24 }
 0x2a4   :  { %2204 = vrcp.f32 %v1167_v14 }
 0x2a5   :  { %v1187_v25 = vpop.xlane.xlu1 %1186  ;;  %2206 = vrcp.f32 %v1165_v40  ;;  %v1189_v12 = vpop.xlane.xlu0 %1188 }
 0x2a6   :  { %2208 = vrcp.f32 %v1187_v25 }
 0x2a7   :  { %2210 = vrcp.f32 %v1185_v28 }
 0x2a8   :  { %2212 = vrcp.f32 %v1171_v5 }
 0x2a9   :  { %v1191_v48 = vpop.xlane.xlu1 %1190  ;;  %2214 = vrcp.f32 %v1169_v13  ;;  %v1193_v38 = vpop.xlane.xlu0 %1192 }
 0x2aa   :  { %2216 = vrcp.f32 %v1191_v48 }
 0x2ab   :  { %2218 = vrcp.f32 %v1189_v12 }
 0x2ac   :  { %2220 = vrcp.f32 %v1175_v9 }
 0x2ad   :  { %v1195_v35 = vpop.xlane.xlu1 %1194  ;;  %2222 = vrcp.f32 %v1173_v20  ;;  %v1197_v42 = vpop.xlane.xlu0 %1196 }
 0x2ae   :  { %2224 = vrcp.f32 %v1195_v35 }
 0x2af   :  { %v2201_v3 = vpop.eup %2200  ;;  %2226 = vrcp.f32 %v1193_v38 }
 0x2b0   :  { %v2203_v21 = vpop.eup %2202  ;;  %2228 = vrcp.f32 %v1179_v23 }
 0x2b1   :  { %v2205_v10 = vpop.eup %2204  ;;  %v1199_v54 = vpop.xlane.xlu1 %1198  ;;  %2230 = vrcp.f32 %v1177_v50 }
 0x2b2   :  { %v2207_v61 = vpop.eup %2206  ;;  %2232 = vrcp.f32 %v1199_v54  ;;  %v1201_v7 = vpop.xlane.xlu0 %1200 }
 0x2b3   :  { %v2209_v47 = vpop.eup %2208  ;;  %2234 = vrcp.f32 %v1197_v42 }
 0x2b4   :  { %v2211_v18 = vpop.eup %2210 }
 0x2b5   :  { %v2213_v39 = vpop.eup %2212  ;;  %v1203_v27 = vpop.xlane.xlu1 %1202 }
 0x2b6   :  { %v2215_v11 = vpop.eup %2214  ;;  %2236 = vrcp.f32 %v1203_v27  ;;  %v1205_v24 = vpop.xlane.xlu0 %1204 }
 0x2b7   :  { %v2090_v26 = vpop.f32.mrf.mxu1  ;;  %v2217_v36 = vpop.eup %2216  ;;  %2238 = vrcp.f32 %v1201_v7 }
 0x2b8   :  { %v1551_v6 = vmul.f32 %v2201_v3, %v2090_v26  ;;  %v2219_v22 = vpop.eup %2218 }
 0x2b9   :  { %v1423_v33 = vpop.f32.mrf.mxu1  ;;  %v2221_v16 = vpop.eup %2220 }
 0x2ba   :  { %1583 = vst [vmem:[#allocation8 + $0x88] sm:$0xff] %v1551_v6  ;;  %v1550_v17 = vmul.f32 %v2203_v21, %v1423_v33  ;;  %v2223_v43 = vpop.eup %2222  ;;  %v1207_v40 = vpop.xlane.xlu1 %1206 }
 0x2bb   :  { %v2225_v15 = vpop.eup %2224  ;;  %2240 = vrcp.f32 %v1207_v40  ;;  %v1209_v21 = vpop.xlane.xlu0 %1208 }
 0x2bc   :  { %v2046_v53 = vpop.f32.mrf.mxu0  ;;  %1582 = vst [vmem:[#allocation8 + $0x80] sm:$0xff] %v1550_v17  ;;  %v2227_v60 = vpop.eup %2226  ;;  %2242 = vrcp.f32 %v1205_v24 }
 0x2bd   :  { %v1543_v55 = vmul.f32 %v2205_v10, %v2046_v53  ;;  %v2229_v52 = vpop.eup %2228 }
 0x2be   :  { %v1318_v34 = vpop.f32.mrf.mxu0  ;;  %v2231_v14 = vpop.eup %2230 }
 0x2bf   :  { %1575 = vst [vmem:[#allocation8 + $0x48] sm:$0xff] %v1543_v55  ;;  %v1542_v62 = vmul.f32 %v2207_v61, %v1318_v34  ;;  %v2093_v8 = vpop.f32.mrf.mxu1  ;;  %v2233_v13 = vpop.eup %2232 }
 0x2c0   :  { %v1553_v31 = vmul.f32 %v2209_v47, %v2093_v8  ;;  %v2235_v58 = vpop.eup %2234  ;;  %v1211_v48 = vpop.xlane.xlu1 %1210 }
 0x2c1   :  { %1574 = vst [vmem:[#allocation8 + $0x40] sm:$0xff] %v1542_v62  ;;  %v1433_v59 = vpop.f32.mrf.mxu1  ;;  %2244 = vrcp.f32 %v1211_v48 }
 0x2c2   :  { %1585 = vst [vmem:[#allocation8 + $0x98] sm:$0xff] %v1553_v31  ;;  %v1552_v44 = vmul.f32 %v2211_v18, %v1433_v59  ;;  %2246 = vrcp.f32 %v1209_v21 }
 0x2c3   :  { %v2237_v3 = vpop.eup %2236 }
 0x2c4   :  { %1584 = vst [vmem:[#allocation8 + $0x90] sm:$0xff] %v1552_v44  ;;  %v2049_v57 = vpop.f32.mrf.mxu0  ;;  %v2239_v12 = vpop.eup %2238 }
 0x2c5   :  { %v1545_v41 = vmul.f32 %v2213_v39, %v2049_v57 }
 0x2c6   :  { %v1328_v30 = vpop.f32.mrf.mxu0 }
 0x2c7   :  { %1577 = vst [vmem:[#allocation8 + $0x58] sm:$0xff] %v1545_v41  ;;  %v1544_v32 = vmul.f32 %v2215_v11, %v1328_v30  ;;  %v2096_v37 = vpop.f32.mrf.mxu1 }
 0x2c8   :  { %v1555_v0 = vmul.f32 %v2217_v36, %v2096_v37  ;;  %v2241_v10 = vpop.eup %2240 }
 0x2c9   :  { %1576 = vst [vmem:[#allocation8 + $0x50] sm:$0xff] %v1544_v32  ;;  %v1443_v46 = vpop.f32.mrf.mxu1  ;;  %v2243_v61 = vpop.eup %2242 }
 0x2ca   :  { %1587 = vst [vmem:[#allocation8 + $0xa8] sm:$0xff] %v1555_v0  ;;  %v1554_v49 = vmul.f32 %v2219_v22, %v1443_v46 }
 0x2cc   :  { %1586 = vst [vmem:[#allocation8 + $0xa0] sm:$0xff] %v1554_v49  ;;  %v2052_v51 = vpop.f32.mrf.mxu0 }
 0x2cd   :  { %v1547_v4 = vmul.f32 %v2221_v16, %v2052_v51 }
 0x2ce   :  { %v1338_v1 = vpop.f32.mrf.mxu0  ;;  %v2245_v35 = vpop.eup %2244 }
 0x2cf   :  { %1579 = vst [vmem:[#allocation8 + $0x68] sm:$0xff] %v1547_v4  ;;  %v1546_v2 = vmul.f32 %v2223_v43, %v1338_v1  ;;  %v2099_v29 = vpop.f32.mrf.mxu1  ;;  %v2247_v31 = vpop.eup %2246 }
 0x2d0   :  { %v1557_v45 = vmul.f32 %v2225_v15, %v2099_v29 }
 0x2d1   :  { %1578 = vst [vmem:[#allocation8 + $0x60] sm:$0xff] %v1546_v2  ;;  %v1453_v19 = vpop.f32.mrf.mxu1 }
 0x2d2   :  { %1589 = vst [vmem:[#allocation8 + $0xb8] sm:$0xff] %v1557_v45  ;;  %v1556_v56 = vmul.f32 %v2227_v60, %v1453_v19 }
 0x2d4   :  { %1588 = vst [vmem:[#allocation8 + $0xb0] sm:$0xff] %v1556_v56 }
 0x2d5   :  { %v2055_v63 = vpop.f32.mrf.mxu0 }
 0x2d6   :  { %v1549_v5 = vmul.f32 %v2229_v52, %v2055_v63 }
 0x2d7   :  { %v1348_v9 = vpop.f32.mrf.mxu0  ;;  %v2102_v20 = vpop.f32.mrf.mxu1 }
 0x2d8   :  { %1581 = vst [vmem:[#allocation8 + $0x78] sm:$0xff] %v1549_v5  ;;  %v1548_v23 = vmul.f32 %v2231_v14, %v1348_v9  ;;  %v1559_v50 = vmul.f32 %v2233_v13, %v2102_v20 }
 0x2d9   :  { %v1463_v25 = vpop.f32.mrf.mxu1 }
 0x2da   :  { %1580 = vst [vmem:[#allocation8 + $0x70] sm:$0xff] %v1548_v23  ;;  %1591 = vst [vmem:[#allocation8 + $0xc8] sm:$0xff] %v1559_v50  ;;  %v1558_v28 = vmul.f32 %v2235_v58, %v1463_v25 }
 0x2dc   :  { %1590 = vst [vmem:[#allocation8 + $0xc0] sm:$0xff] %v1558_v28 }
 0x2df   :  { %v2105_v26 = vpop.f32.mrf.mxu1 }
 0x2e0   :  { %v1561_v6 = vmul.f32 %v2237_v3, %v2105_v26 }
 0x2e1   :  { %v1473_v33 = vpop.f32.mrf.mxu1 }
 0x2e2   :  { %1593 = vst [vmem:[#allocation8 + $0xd8] sm:$0xff] %v1561_v6  ;;  %v1560_v17 = vmul.f32 %v2239_v12, %v1473_v33 }
 0x2e4   :  { %1592 = vst [vmem:[#allocation8 + $0xd0] sm:$0xff] %v1560_v17 }
 0x2e7   :  { %v2108_v53 = vpop.f32.mrf.mxu1 }
 0x2e8   :  { %v1563_v55 = vmul.f32 %v2241_v10, %v2108_v53 }
 0x2e9   :  { %v1483_v34 = vpop.f32.mrf.mxu1 }
 0x2ea   :  { %1595 = vst [vmem:[#allocation8 + $0xe8] sm:$0xff] %v1563_v55  ;;  %v1562_v47 = vmul.f32 %v2243_v61, %v1483_v34 }
 0x2ec   :  { %1594 = vst [vmem:[#allocation8 + $0xe0] sm:$0xff] %v1562_v47 }
 0x2ef   :  { %v2111_v62 = vpop.f32.mrf.mxu1 }
 0x2f0   :  { %v1565_v8 = vmul.f32 %v2245_v35, %v2111_v62 }
 0x2f1   :  { %v1493_v18 = vpop.f32.mrf.mxu1 }
 0x2f2   :  { %1597 = vst [vmem:[#allocation8 + $0xf8] sm:$0xff] %v1565_v8  ;;  %v1564_v38 = vmul.f32 %v2247_v31, %v1493_v18 }
 0x2f4   :  { %1596 = vst [vmem:[#allocation8 + $0xf0] sm:$0xff] %v1564_v38 }
 0x2f5   :  { %2319 = shalt.err (!%p2316_p5)
}
 0x2f6   :  { %1609 = dma.vmem_to_hbm [thread:$0]  %s1604_s2, 4096, %s2728_s3, [#allocation4], %s2335_s15, %s2335_s15, %s2336_s16  }
 0x2f7   :  { %2332 = dma.done.wait [#allocation4], 4096  }
 0x2f8   :  { %2333 = vsyncadd [#allocation4], 4294963200 }
 0x2f9   :  { %1613 = vsyncpa [#allocation3], 1 }
 0x2fa   :  { %1614 = vsyncpa [#allocation6], 1 }
 0x2fb   :  { %1615 = vsyncpa [#allocation4], 1 }

</bundles_post_ra>
